<compile_context>
chip_gen: v6e
topology: v6e:2x2x1
jax: 0.10.0
libtpu: 0.0.40
codegen_flags: <defaults>
</compile_context>

<pallas_src>
import jax
import jax.numpy as jnp
from jax.experimental import pallas as pl
from jax.experimental.pallas import tpu as pltpu

IN_F = 22
H = 80
OUT_F = 1
EPS = 1e-5  # nn.BatchNorm1d default eps


def net_kernel(x_ref, w1_ref, b1_ref, w2_ref, b2_ref, w3_ref, b3_ref, o_ref):
    # x_ref: (22, tm)  -- batch on the lane axis
    x = x_ref[...]

    # fc1 (BN already folded into w1/b1): (80,22) @ (22,tm) -> (80,tm)
    h1 = jnp.dot(w1_ref[...], x, preferred_element_type=jnp.float32) + b1_ref[...]
    h1 = jax.nn.sigmoid(h1)

    # dropout d1: identity in eval mode
    # TODO(synk): training-mode dropout (Bernoulli mask via pltpu.prng_random_bits) not reproduced.

    # fc2: (80,80) @ (80,tm) -> (80,tm)
    h2 = jnp.dot(w2_ref[...], h1, preferred_element_type=jnp.float32) + b2_ref[...]
    h2 = jax.nn.sigmoid(h2)

    # dropout d2: identity in eval mode

    # fc3: (1,80) @ (80,tm) -> (1,tm)  -- lane-dense output store
    out = jnp.dot(w3_ref[...], h2, preferred_element_type=jnp.float32) + b3_ref[...]
    o_ref[...] = out.astype(o_ref.dtype)


def net_forward(x, params, *, tm=512):
    """x: (N, 22) float32. Returns (N, 1) float32."""
    N, F = x.shape
    assert F == IN_F

    (gamma, beta, mean, var, w1, b1, w2, b2, w3, b3) = params

    # ---- Fold BatchNorm1d (eval) into fc1:  xn = s*x + t,  s = gamma/sqrt(var+eps)
    #      fc1(xn) = (w1 * s) @ x + (b1 + w1 @ t)
    s = gamma / jnp.sqrt(var + EPS)                 # (22,)
    t = beta - mean * s                             # (22,)
    w1f = w1 * s[None, :]                           # (80, 22)
    b1f = b1 + w1 @ t                               # (80,)

    # Biases as column vectors so they broadcast across the lane (batch) axis.
    b1c = b1f.reshape(H, 1)
    b2c = b2.reshape(H, 1)
    b3c = b3.reshape(OUT_F, 1)

    # ---- Pad batch to a multiple of tm and transpose: batch on the lane axis.
    n_tiles = pl.cdiv(N, tm)
    n_pad = n_tiles * tm
    xT = jnp.zeros((IN_F, n_pad), x.dtype).at[:, :N].set(x.T)

    grid_spec = pltpu.PrefetchScalarGridSpec(
        num_scalar_prefetch=0,
        grid=(n_tiles,),
        in_specs=[
            pl.BlockSpec((IN_F, tm), lambda i: (0, i)),     # x^T tile over batch
            pl.BlockSpec((H, IN_F), lambda i: (0, 0)),      # w1 (BN-folded), (80, 22)
            pl.BlockSpec((H, 1), lambda i: (0, 0)),         # b1 (80, 1)
            pl.BlockSpec((H, H), lambda i: (0, 0)),         # w2 (80, 80)
            pl.BlockSpec((H, 1), lambda i: (0, 0)),         # b2 (80, 1)
            pl.BlockSpec((OUT_F, H), lambda i: (0, 0)),     # w3 (1, 80)
            pl.BlockSpec((OUT_F, 1), lambda i: (0, 0)),     # b3 (1, 1)
        ],
        out_specs=pl.BlockSpec((OUT_F, tm), lambda i: (0, i)),
    )

    outT = pl.pallas_call(
        net_kernel,
        out_shape=jax.ShapeDtypeStruct((OUT_F, n_pad), jnp.float32),
        grid_spec=grid_spec,
        compiler_params=pltpu.CompilerParams(
            dimension_semantics=("parallel",)),
    )(xT, w1f, b1c, w2, b2c, w3, b3c)

    # Back to PyTorch layout (N, 1), dropping padded rows.
    return outT[:, :N].T


def init_params(key):
    """Deterministic parameter init; PyTorch-native (out_features, in_features) weights."""
    keys = jax.random.split(key, 10)
    # Non-trivial BatchNorm1d stats/affine so the BN fold is actually exercised.
    gamma = 1.0 + 0.1 * jax.random.normal(keys[0], (IN_F,), jnp.float32)
    beta = 0.1 * jax.random.normal(keys[1], (IN_F,), jnp.float32)
    mean = 0.1 * jax.random.normal(keys[2], (IN_F,), jnp.float32)
    var = jax.random.uniform(keys[3], (IN_F,), jnp.float32, 0.5, 1.5)
    w1 = jax.random.normal(keys[4], (H, IN_F), jnp.float32) * 0.1
    b1 = jax.random.normal(keys[5], (H,), jnp.float32) * 0.1
    w2 = jax.random.normal(keys[6], (H, H), jnp.float32) * 0.1
    b2 = jax.random.normal(keys[7], (H,), jnp.float32) * 0.1
    w3 = jax.random.normal(keys[8], (OUT_F, H), jnp.float32) * 0.1
    b3 = jax.random.normal(keys[9], (OUT_F,), jnp.float32) * 0.1
    return (gamma, beta, mean, var, w1, b1, w2, b2, w3, b3)


def reference_forward(x, params):
    """Pure-JAX reference (matches the PyTorch eval-mode forward)."""
    gamma, beta, mean, var, w1, b1, w2, b2, w3, b3 = params
    hp = jax.lax.Precision.HIGHEST
    xn = (x - mean) / jnp.sqrt(var + EPS) * gamma + beta
    h1 = jax.nn.sigmoid(jnp.dot(xn, w1.T, precision=hp) + b1)
    h2 = jax.nn.sigmoid(jnp.dot(h1, w2.T, precision=hp) + b2)
    return jnp.dot(h2, w3.T, precision=hp) + b3


if __name__ == "__main__":
    key = jax.random.PRNGKey(0)
    kx, kp = jax.random.split(key)

    N = 1000  # intentionally ragged (not a multiple of tm) to exercise padding
    x = jax.random.normal(kx, (N, IN_F), jnp.float32)
    params = init_params(kp)

    out = net_forward(x, params, tm=512)
    out = jax.block_until_ready(out)

    ref = reference_forward(x, params)
    assert out.shape == (N, OUT_F)
    assert jnp.allclose(out, ref, atol=1e-4, rtol=1e-4), "mismatch vs reference"

    print("KERNEL_OK")
</pallas_src>

<mosaic_0001>
module attributes {stable_mosaic.version = 11 : i64} {
  func.func @net_kernel(%arg0: i32, %arg1: memref<22x512xf32, #tpu.memory_space<vmem>>, %arg2: memref<80x22xf32, #tpu.memory_space<vmem>>, %arg3: memref<80x1xf32, #tpu.memory_space<vmem>>, %arg4: memref<80x80xf32, #tpu.memory_space<vmem>>, %arg5: memref<80x1xf32, #tpu.memory_space<vmem>>, %arg6: memref<1x80xf32, #tpu.memory_space<vmem>>, %arg7: memref<1x1xf32, #tpu.memory_space<vmem>>, %arg8: memref<1x512xf32, #tpu.memory_space<vmem>>) attributes {dimension_semantics = [#tpu.dimension_semantics<parallel>], iteration_bounds = array<i64: 2>, scalar_prefetch = 0 : i64, scratch_operands = 0 : i64, tpu.core_type = #tpu.core_type<tc>, window_params = [{transform_indices = @transform_0, window_bounds = array<i64: 22, 512>}, {pipeline_mode = #tpu.pipeline_mode<synchronous>, transform_indices = @transform_1, window_bounds = array<i64: 80, 22>}, {pipeline_mode = #tpu.pipeline_mode<synchronous>, transform_indices = @transform_2, window_bounds = array<i64: 80, 1>}, {pipeline_mode = #tpu.pipeline_mode<synchronous>, transform_indices = @transform_3, window_bounds = array<i64: 80, 80>}, {pipeline_mode = #tpu.pipeline_mode<synchronous>, transform_indices = @transform_4, window_bounds = array<i64: 80, 1>}, {pipeline_mode = #tpu.pipeline_mode<synchronous>, transform_indices = @transform_5, window_bounds = array<i64: 1, 80>}, {pipeline_mode = #tpu.pipeline_mode<synchronous>, transform_indices = @transform_6, window_bounds = array<i64: 1, 1>}, {transform_indices = @transform_7, window_bounds = array<i64: 1, 512>}]} {
    %c0 = arith.constant 0 : index
    %c0_0 = arith.constant 0 : index
    %0 = vector.load %arg1[%c0, %c0_0] : memref<22x512xf32, #tpu.memory_space<vmem>>, vector<22x512xf32>
    %c0_1 = arith.constant 0 : index
    %c0_2 = arith.constant 0 : index
    %1 = vector.load %arg2[%c0_1, %c0_2] : memref<80x22xf32, #tpu.memory_space<vmem>>, vector<80x22xf32>
    %cst = arith.constant dense<0.000000e+00> : vector<80x512xf32>
    %2 = tpu.matmul %1, %0, %cst {dimension_numbers = #tpu.dot_dimension_numbers<[1], [0], [0], [1], [0, 0, 1, 1], [], []>} : vector<80x22xf32>, vector<22x512xf32>, vector<80x512xf32> -> vector<80x512xf32>
    %c0_3 = arith.constant 0 : index
    %c0_4 = arith.constant 0 : index
    %3 = vector.load %arg3[%c0_3, %c0_4] : memref<80x1xf32, #tpu.memory_space<vmem>>, vector<80x1xf32>
    %4 = vector.broadcast %3 : vector<80x1xf32> to vector<80x512xf32>
    %5 = arith.addf %2, %4 : vector<80x512xf32>
    %6 = arith.negf %5 : vector<80x512xf32>
    %7 = math.exp %6 : vector<80x512xf32>
    %cst_5 = arith.constant 1.000000e+00 : f32
    %8 = vector.broadcast %cst_5 : f32 to vector<80x512xf32>
    %9 = arith.addf %8, %7 : vector<80x512xf32>
    %10 = arith.divf %8, %9 : vector<80x512xf32>
    %c0_6 = arith.constant 0 : index
    %c0_7 = arith.constant 0 : index
    %11 = vector.load %arg4[%c0_6, %c0_7] : memref<80x80xf32, #tpu.memory_space<vmem>>, vector<80x80xf32>
    %cst_8 = arith.constant dense<0.000000e+00> : vector<80x512xf32>
    %12 = tpu.matmul %11, %10, %cst_8 {dimension_numbers = #tpu.dot_dimension_numbers<[1], [0], [0], [1], [0, 0, 1, 1], [], []>} : vector<80x80xf32>, vector<80x512xf32>, vector<80x512xf32> -> vector<80x512xf32>
    %c0_9 = arith.constant 0 : index
    %c0_10 = arith.constant 0 : index
    %13 = vector.load %arg5[%c0_9, %c0_10] : memref<80x1xf32, #tpu.memory_space<vmem>>, vector<80x1xf32>
    %14 = vector.broadcast %13 : vector<80x1xf32> to vector<80x512xf32>
    %15 = arith.addf %12, %14 : vector<80x512xf32>
    %16 = arith.negf %15 : vector<80x512xf32>
    %17 = math.exp %16 : vector<80x512xf32>
    %cst_11 = arith.constant 1.000000e+00 : f32
    %18 = vector.broadcast %cst_11 : f32 to vector<80x512xf32>
    %19 = arith.addf %18, %17 : vector<80x512xf32>
    %20 = arith.divf %18, %19 : vector<80x512xf32>
    %c0_12 = arith.constant 0 : index
    %c0_13 = arith.constant 0 : index
    %21 = vector.load %arg6[%c0_12, %c0_13] : memref<1x80xf32, #tpu.memory_space<vmem>>, vector<1x80xf32>
    %cst_14 = arith.constant dense<0.000000e+00> : vector<1x512xf32>
    %22 = tpu.matmul %21, %20, %cst_14 {dimension_numbers = #tpu.dot_dimension_numbers<[1], [0], [0], [1], [0, 0, 1, 1], [], []>} : vector<1x80xf32>, vector<80x512xf32>, vector<1x512xf32> -> vector<1x512xf32>
    %c0_15 = arith.constant 0 : index
    %c0_16 = arith.constant 0 : index
    %23 = vector.load %arg7[%c0_15, %c0_16] : memref<1x1xf32, #tpu.memory_space<vmem>>, vector<1x1xf32>
    %24 = vector.broadcast %23 : vector<1x1xf32> to vector<1x512xf32>
    %25 = arith.addf %22, %24 : vector<1x512xf32>
    %c0_17 = arith.constant 0 : index
    %c0_18 = arith.constant 0 : index
    %26 = vector.load %arg8[%c0_17, %c0_18] : memref<1x512xf32, #tpu.memory_space<vmem>>, vector<1x512xf32>
    tpu.vector_store %arg8[%c0_17, %c0_18], %25 {strides = array<i32>} : memref<1x512xf32, #tpu.memory_space<vmem>>, vector<1x512xf32>,
    return
  }
  func.func @transform_0(%arg0: i32) -> (i32, i32) {
    %c0_i32 = arith.constant 0 : i32
    %c0_i32_0 = arith.constant 0 : i32
    return %c0_i32, %arg0 : i32, i32
  }
  func.func @transform_1(%arg0: i32) -> (i32, i32) {
    %c0_i32 = arith.constant 0 : i32
    %c0_i32_0 = arith.constant 0 : i32
    %c0_i32_1 = arith.constant 0 : i32
    return %c0_i32, %c0_i32_0 : i32, i32
  }
  func.func @transform_2(%arg0: i32) -> (i32, i32) {
    %c0_i32 = arith.constant 0 : i32
    %c0_i32_0 = arith.constant 0 : i32
    %c0_i32_1 = arith.constant 0 : i32
    return %c0_i32, %c0_i32_0 : i32, i32
  }
  func.func @transform_3(%arg0: i32) -> (i32, i32) {
    %c0_i32 = arith.constant 0 : i32
    %c0_i32_0 = arith.constant 0 : i32
    %c0_i32_1 = arith.constant 0 : i32
    return %c0_i32, %c0_i32_0 : i32, i32
  }
  func.func @transform_4(%arg0: i32) -> (i32, i32) {
    %c0_i32 = arith.constant 0 : i32
    %c0_i32_0 = arith.constant 0 : i32
    %c0_i32_1 = arith.constant 0 : i32
    return %c0_i32, %c0_i32_0 : i32, i32
  }
  func.func @transform_5(%arg0: i32) -> (i32, i32) {
    %c0_i32 = arith.constant 0 : i32
    %c0_i32_0 = arith.constant 0 : i32
    %c0_i32_1 = arith.constant 0 : i32
    return %c0_i32, %c0_i32_0 : i32, i32
  }
  func.func @transform_6(%arg0: i32) -> (i32, i32) {
    %c0_i32 = arith.constant 0 : i32
    %c0_i32_0 = arith.constant 0 : i32
    %c0_i32_1 = arith.constant 0 : i32
    return %c0_i32, %c0_i32_0 : i32, i32
  }
  func.func @transform_7(%arg0: i32) -> (i32, i32) {
    %c0_i32 = arith.constant 0 : i32
    %c0_i32_0 = arith.constant 0 : i32
    return %c0_i32, %arg0 : i32, i32
  }
}

</mosaic_0001>

<bundles_post_ra>
// kernel: tpu_custom_call.1
= control target key start
LH: loop header
LB: loop body
LE: loop exit
PB: predicated region body
PF: predicated region fallthrough
CT: control target
= control target key end

     0   :  { %s3005_s0 = inlined_call_operand.vmem [shape: f32[22,1024], index: 0, kind: input, shape index: {}]   ;;  %s3006_s1 = inlined_call_operand.vmem [shape: f32[80,22], index: 1, kind: input, shape index: {}]   ;;  %s3007_s2 = inlined_call_operand.vmem [shape: f32[80,1], index: 2, kind: input, shape index: {}]   ;;  %s3008_s3 = inlined_call_operand.vmem [shape: f32[80,80], index: 3, kind: input, shape index: {}]   ;;  %s3009_s4 = inlined_call_operand.vmem [shape: f32[80,1], index: 4, kind: input, shape index: {}]   ;;  %s3010_s5 = inlined_call_operand.vmem [shape: f32[1,80], index: 5, kind: input, shape index: {}]   ;;  %s3011_s6 = inlined_call_operand.<no memory space> [shape: f32[1,1], index: 6, kind: input, shape index: {}]   ;;  %s3012_s7 = inlined_call_operand.hbm [shape: f32[1,1024], index: 7, kind: output, shape index: {}]  }
   0x1   :  { %v12_v0 = vstv %s3011_s6 }
   0x2   :  { %13 = vst [vmem:[#allocation2] sm:$0x1] %v12_v0 }
   0x3   :  { %14 = vsyncpa [#allocation5], 0 }
   0x4   :  { %16 = vsyncpa [#allocation5 + $0x1], 0  ;;  %s2415_s26 = smov 0   ;;  %s2417_s27 = smov 0  }
   0x5   :  { %s2419_s28 = smov 0   ;;  %s2421_s29 = smov 0  }
   0x6 LB: > { %s1799_s6 = sadd.s32 4294967295, %s2366_s29   ;;  %s1800_s30 = sadd.s32 4294967294, %s2366_s29   ;;  %s2366_s29 = sphi %s2421_s29, %s3020_s29   ;;  %s2362_s28 = sphi %s2419_s28, %s3019_s28   ;;  %s2358_s27 = sphi %s2417_s27, %s3018_s27   ;;  %s2354_s26 = sphi %s2415_s26, %s3017_s26  }
   0x7   : > { %s2438_s8 = sadd.s32 1, %s2366_s29   ;;  %s29_s9 = sadd.s32 1, %s2362_s28 }
   0x8   : > { %s26_s10 = ssub.s32 %s2366_s29, %s2438_s8  ;;  %p36_p0 = scmp.ne.s32.totalorder %s2362_s28, %s2358_s27 }
   0x9   : > { %p27_p1 = scmp.eq.s32.totalorder %s26_s10, 0  ;;  %p37_p2 = scmp.eq.s32.totalorder %s2366_s29, 0 }
   0xa   : > { %p192_p3 = scmp.eq.s32.totalorder %s1799_s6, 1  ;;  %p197_p4 = scmp.ne.s32.totalorder %s2358_s27, %s2354_s26 }
   0xb   : > { %s2451_s11 = scalar_select %p27_p1, %s2362_s28, %s29_s9  }
   0xc   : > { %p38_p5 = por %p37_p2, %p36_p0  ;;  %p2453_p6 = por %p192_p3, %p36_p0 }
   0xd   : > { %p198_p7 = scmp.eq.s32.totalorder %s1800_s30, 1  ;;  %p3013_p9 = scmp.ge.s32.totalorder %s2366_s29, 2 }
   0xf   : > { %p2457_p8 = por %p198_p7, %p197_p4  ;;  %232 = sbr.rel (%p3013_p9) target bundleno = 31 (0x1f), region = 40 }
  0x14   : > { %235 = sbr.rel (!%p38_p5) target bundleno = 31 (0x1f), region = 44  ;;  %s237_s14 = sand.u32 (%p38_p5), 1, %s2362_s28  }
  0x15   : > { %s1938_s15 = sshll.u32 (%p38_p5), %s2366_s29, 5  ;;  %s1940_s16 = smul.u32 (%p38_p5), 96, %s237_s14 }
  0x16   : > { %s242_s19 = scalar_lea.vmem (%p38_p5), %s3005_s0, %s1938_s15 }
  0x17   : > { %v255_v1 = vld [vmem:[%s242_s19] sm:$0xff] (%p38_p5)  ;;  %v257_v2 = vld [vmem:[%s242_s19 + $0x8] sm:$0xff] (%p38_p5)  ;;  %v259_v3 = vld [vmem:[%s242_s19 + $0x10] sm:$0xff] (%p38_p5)  ;;  %s239_s20 = scalar_lea.vmem (%p38_p5), [#allocation3], %s1940_s16 }
  0x18   : > { %v261_v4 = vld [vmem:[%s242_s19 + $0x18] sm:$0xff] (%p38_p5)  ;;  %v263_v5 = vld [vmem:[%s242_s19 + $0x40] sm:$0xff] (%p38_p5)  ;;  %v265_v6 = vld [vmem:[%s242_s19 + $0x48] sm:$0xff] (%p38_p5)  ;;  %256 = vst [vmem:[%s239_s20] sm:$0xff] (%p38_p5), %v255_v1 }
  0x19   : > { %258 = vst [vmem:[%s239_s20 + $0x8] sm:$0xff] %v257_v2  ;;  %260 = vst [vmem:[%s239_s20 + $0x10] sm:$0xff] %v259_v3  ;;  %v267_v7 = vld [vmem:[%s242_s19 + $0x50] sm:$0xff]  ;;  %v269_v8 = vld [vmem:[%s242_s19 + $0x58] sm:$0xff] }
  0x1a   : > { %262 = vst [vmem:[%s239_s20 + $0x18] sm:$0xff] %v261_v4  ;;  %264 = vst [vmem:[%s239_s20 + $0x20] sm:$0xff] %v263_v5  ;;  %v271_v9 = vld [vmem:[%s242_s19 + $0x80] sm:$0xff]  ;;  %v273_v10 = vld [vmem:[%s242_s19 + $0x88] sm:$0xff] }
  0x1b   : > { %266 = vst [vmem:[%s239_s20 + $0x28] sm:$0xff] %v265_v6  ;;  %268 = vst [vmem:[%s239_s20 + $0x30] sm:$0xff] %v267_v7  ;;  %v275_v11 = vld [vmem:[%s242_s19 + $0x90] sm:$0xff]  ;;  %v277_v12 = vld [vmem:[%s242_s19 + $0x98] sm:$0xff] }
  0x1c   : > { %270 = vst [vmem:[%s239_s20 + $0x38] sm:$0xff] %v269_v8  ;;  %272 = vst [vmem:[%s239_s20 + $0x40] sm:$0xff] %v271_v9 }
  0x1d   : > { %274 = vst [vmem:[%s239_s20 + $0x48] sm:$0xff] %v273_v10  ;;  %276 = vst [vmem:[%s239_s20 + $0x50] sm:$0xff] %v275_v11 }
  0x1e   : > { %278 = vst [vmem:[%s239_s20 + $0x58] sm:$0xff] %v277_v12 }
  0x1f PF: > { %p1805_p10 = scmp.ge.s32.totalorder %s2366_s29, 1  ;;  %p283_p11 = scmp.lt.s32.totalorder %s2366_s29, 3 }
  0x21   : > { %p284_p12 = pnand %p1805_p10, %p283_p11 }
  0x22   : > { %s2472_s21 = sand.u32 (!%p284_p12), 1, %s2358_s27   ;;  %s1939_s23 = sshll.u32 (!%p284_p12), %s1799_s6, 6 }
  0x23   : > { %287 = sbr.rel (%p284_p12) target bundleno = 862 (0x35e), region = 67  ;;  %s1733_s10 = scalar_lea.hbm (!%p284_p12), %s3012_s7, %s1939_s23 }
  0x24   : > { %s1941_s22 = smul.u32 (!%p284_p12), 96, %s2472_s21  ;;  %s1721_s14 = scalar_lea.sflag (!%p284_p12), [#allocation5], %s2472_s21 }
  0x25   : > { %s2371_s16 = smov (!%p284_p12), [#allocation4]  }
  0x26   : > { %s292_s25 = scalar_lea.vmem (!%p284_p12), [#allocation3], %s1941_s22  ;;  %s1806_s22 = sshll.u32 (!%p284_p12), %s2472_s21, 2 }
  0x27   : > { %s320_s24 = scalar_lea.vmem (!%p284_p12), [#allocation4], %s1806_s22  ;;  %s2310_s17 = sshll.u32 (!%p284_p12), %s2371_s16, 4  ;;  %s2311_s17 = int_to_ptr.vmem [resolvable:$false] %s2310_s17 }
  0x28   : > { %v2368_v13 = vmov 0.0   ;;  %vm436_vm0 = vcmask 1045504   ;;  %v2369_v14 = vmov 0   ;;  %v352_v15 = vld [vmem:[%s3007_s2 + $0x38] sm:$0xff]  ;;  %v332_v16 = vld [vmem:[%s292_s25 + $0x48] sm:$0x3f] }
  0x29   : > { %513 = vmatprep.mubr.f32.mxu0 %v2368_v13  ;;  %638 = vmatprep.mubr.f32.mxu1 %v2368_v13  ;;  %v334_v17 = vld [vmem:[%s292_s25 + $0x58] sm:$0x3f]  ;;  %v331_v18 = vld [vmem:[%s292_s25 + $0x40] sm:$0x3f]  ;;  %v333_v19 = vld [vmem:[%s292_s25 + $0x50] sm:$0x3f] }
  0x2a   : > { %1985 = vset.pattern.permute.xlu1 %v2369_v14  ;;  %1984 = vset.pattern.permute.xlu0 %v2369_v14  ;;  %v328_v20 = vld [vmem:[%s292_s25 + $0x28] sm:$0xff]  ;;  %v330_v21 = vld [vmem:[%s292_s25 + $0x38] sm:$0xff]  ;;  %v327_v22 = vld [vmem:[%s292_s25 + $0x20] sm:$0xff]  ;;  %vm405_vm1 = vcmask 179200   ;;  %vm1009_vm2 = vcmask 654336   ;;  %s2312_s6 = scalar_lea.vmem %s2311_s17, 128 }
  0x2b   : > { %392 = vperm.xlu1 %1985, %v352_v15   ;;  %1807 = vmatprep.subr.msk.mxu0 %vm436_vm0, %v332_v16  ;;  %v329_v23 = vld [vmem:[%s292_s25 + $0x30] sm:$0xff]  ;;  %v324_v24 = vld [vmem:[%s292_s25 + $0x8] sm:$0xff]  ;;  %v326_v25 = vld [vmem:[%s292_s25 + $0x18] sm:$0xff] }
  0x2c   : > { %1819 = vmatprep.subr.msk.mxu1 %vm436_vm0, %v334_v17  ;;  %1808 = vmatpush1.msk.msra.mxu0 %vm436_vm0, %v331_v18  ;;  %v323_v26 = vld [vmem:[%s292_s25] sm:$0xff]  ;;  %v325_v27 = vld [vmem:[%s292_s25 + $0x10] sm:$0xff]  ;;  %v1531_v57 = vld [vmem:[#allocation2] sm:$0x1]  ;;  %s1735_s25 = sshll.u32 %s320_s24, 4  ;;  %s1736_s25 = int_to_ptr.vmem [resolvable:$true] %s1735_s25 }
  0x2d   : > { %1820 = vmatpush1.msk.msra.mxu1 %vm436_vm0, %v333_v19  ;;  %477 = vmatprep.subr.mxu0 %v328_v20  ;;  %v335_v28 = vld [vmem:[%s3006_s1] sm:$0xff]  ;;  %v354_v29 = vld [vmem:[%s3007_s2 + $0x48] sm:$0xff]  ;;  %v351_v30 = vld [vmem:[%s3007_s2 + $0x30] sm:$0xff]  ;;  %s2306_s15 = scalar_lea.vmem %s1736_s25, 64  ;;  %p2313_p2 = scmp.lt.s32.totalorder %s1736_s25, %s2311_s17 }
  0x2e   : > { %602 = vmatprep.subr.mxu1 %v330_v21  ;;  %478 = vmatpush1.msra.mxu0 %v327_v22  ;;  %v336_v31 = vld [vmem:[%s3006_s1 + $0x8] sm:$0xff]  ;;  %v353_v32 = vld [vmem:[%s3007_s2 + $0x40] sm:$0xff]  ;;  %v337_v34 = vld [vmem:[%s3006_s1 + $0x10] sm:$0xff]  ;;  %p2307_p13 = scmp.ne.s32.totalorder %s1736_s25, %s2306_s15  ;;  %p2314_p3 = scmp.lt.s32.totalorder %s2312_s6, %s2306_s15 }
  0x2f   : > { %603 = vmatpush1.msra.mxu1 %v329_v23  ;;  %479 = vmatprep.subr.mxu0 %v324_v24  ;;  %v349_v33 = vld [vmem:[%s3007_s2 + $0x20] sm:$0xff]  ;;  %v350_v35 = vld [vmem:[%s3007_s2 + $0x28] sm:$0xff]  ;;  %v347_v36 = vld [vmem:[%s3007_s2 + $0x10] sm:$0xff] }
  0x30   : > { %604 = vmatprep.subr.mxu1 %v326_v25  ;;  %480 = vmatpush1.msra.mxu0 %v323_v26  ;;  %v338_v37 = vld [vmem:[%s3006_s1 + $0x18] sm:$0xff]  ;;  %v345_v39 = vld [vmem:[%s3007_s2] sm:$0xff]  ;;  %v346_v41 = vld [vmem:[%s3007_s2 + $0x8] sm:$0xff]  ;;  %p2308_p0 = pnand %p2307_p13, %p2453_p6  ;;  %p2315_p4 = por %p2314_p3, %p2313_p2 }
  0x31   : > { %605 = vmatpush1.msra.mxu1 %v325_v27  ;;  %1809 = vmatmul.mubr.msk.f32.vlgmr.msra.gmra.mxu0 %vm405_vm1, %v335_v28  ;;  %v348_v38 = vld [vmem:[%s3007_s2 + $0x18] sm:$0xff]  ;;  %v339_v40 = vld [vmem:[%s3006_s1 + $0x20] sm:$0xff]  ;;  %v340_v43 = vld [vmem:[%s3006_s1 + $0x28] sm:$0xff] }
  0x32   : > { %1821 = vmatmul.mubr.msk.f32.vlgmr.msra.gmra.mxu1 %vm405_vm1, %v335_v28  ;;  %519 = vmatprep.mubr.f32.mxu0 %v2368_v13  ;;  %v957_v42 = vld [vmem:[%s3009_s4 + $0x40] sm:$0xff]  ;;  %v958_v44 = vld [vmem:[%s3009_s4 + $0x48] sm:$0xff]  ;;  %v955_v45 = vld [vmem:[%s3009_s4 + $0x30] sm:$0xff]  ;;  %p2309_p1 = pneg %p2308_p0 }
  0x33   : > { %644 = vmatprep.mubr.f32.mxu1 %v2368_v13  ;;  %402 = vperm.xlu0 %1984, %v354_v29   ;;  %v341_v46 = vld [vmem:[%s3006_s1 + $0x30] sm:$0xff]  ;;  %v956_v47 = vld [vmem:[%s3009_s4 + $0x38] sm:$0xff]  ;;  %v953_v48 = vld [vmem:[%s3009_s4 + $0x20] sm:$0xff] }
  0x34   : > { %387 = vperm.xlu1 %1985, %v351_v30   ;;  %v342_v49 = vld [vmem:[%s3006_s1 + $0x38] sm:$0xff]  ;;  %v954_v50 = vld [vmem:[%s3009_s4 + $0x28] sm:$0xff]  ;;  %v951_v51 = vld [vmem:[%s3009_s4 + $0x10] sm:$0xff]  ;;  %p2316_p5 = pnand %p2315_p4, %p2309_p1 }
  0x35   : > { %1810 = vmatmul.mubr.msk.f32.gmra.mxu0 %vm405_vm1, %v336_v31  ;;  %v343_v52 = vld [vmem:[%s3006_s1 + $0x40] sm:$0xff]  ;;  %v952_v53 = vld [vmem:[%s3009_s4 + $0x18] sm:$0xff]  ;;  %v344_v55 = vld [vmem:[%s3006_s1 + $0x48] sm:$0xff] }
  0x36   : > { %1822 = vmatmul.mubr.msk.f32.gmra.mxu1 %vm405_vm1, %v336_v31  ;;  %525 = vmatprep.mubr.f32.mxu0 %v2368_v13  ;;  %v949_v54 = vld [vmem:[%s3009_s4] sm:$0xff]  ;;  %v950_v56 = vld [vmem:[%s3009_s4 + $0x8] sm:$0xff] }
  0x37   : > { %650 = vmatprep.mubr.f32.mxu1 %v2368_v13  ;;  %397 = vperm.xlu0 %1984, %v353_v32  }
  0x38   : > { %377 = vperm.xlu1 %1985, %v349_v33  }
  0x39   : > { %1811 = vmatmul.mubr.msk.f32.gmra.mxu0 %vm405_vm1, %v337_v34 }
  0x3a   : > { %1823 = vmatmul.mubr.msk.f32.gmra.mxu1 %vm405_vm1, %v337_v34  ;;  %531 = vmatprep.mubr.f32.mxu0 %v2368_v13 }
  0x3b   : > { %656 = vmatprep.mubr.f32.mxu1 %v2368_v13  ;;  %382 = vperm.xlu0 %1984, %v350_v35  }
  0x3c   : > { %367 = vperm.xlu1 %1985, %v347_v36  }
  0x3d   : > { %1812 = vmatmul.mubr.msk.f32.gmra.mxu0 %vm405_vm1, %v338_v37 }
  0x3e   : > { %1824 = vmatmul.mubr.msk.f32.gmra.mxu1 %vm405_vm1, %v338_v37  ;;  %537 = vmatprep.mubr.f32.mxu0 %v2368_v13 }
  0x3f   : > { %662 = vmatprep.mubr.f32.mxu1 %v2368_v13  ;;  %372 = vperm.xlu0 %1984, %v348_v38  }
  0x40   : > { %357 = vperm.xlu1 %1985, %v345_v39  }
  0x41   : > { %1813 = vmatmul.mubr.msk.f32.gmra.mxu0 %vm405_vm1, %v339_v40 }
  0x42   : > { %1825 = vmatmul.mubr.msk.f32.gmra.mxu1 %vm405_vm1, %v339_v40  ;;  %543 = vmatprep.mubr.f32.mxu0 %v2368_v13 }
  0x43   : > { %668 = vmatprep.mubr.f32.mxu1 %v2368_v13  ;;  %362 = vperm.xlu0 %1984, %v346_v41  }
  0x44   : > { %1001 = vperm.xlu1 %1985, %v957_v42  }
  0x45   : > { %1814 = vmatmul.mubr.msk.f32.gmra.mxu0 %vm405_vm1, %v340_v43 }
  0x46   : > { %1826 = vmatmul.mubr.msk.f32.gmra.mxu1 %vm405_vm1, %v340_v43  ;;  %549 = vmatprep.mubr.f32.mxu0 %v2368_v13 }
  0x47   : > { %674 = vmatprep.mubr.f32.mxu1 %v2368_v13  ;;  %1006 = vperm.xlu0 %1984, %v958_v44  }
  0x48   : > { %991 = vperm.xlu1 %1985, %v955_v45  }
  0x49   : > { %1815 = vmatmul.mubr.msk.f32.gmra.mxu0 %vm405_vm1, %v341_v46 }
  0x4a   : > { %1827 = vmatmul.mubr.msk.f32.gmra.mxu1 %vm405_vm1, %v341_v46  ;;  %555 = vmatprep.mubr.f32.mxu0 %v2368_v13 }
  0x4b   : > { %680 = vmatprep.mubr.f32.mxu1 %v2368_v13  ;;  %996 = vperm.xlu0 %1984, %v956_v47  }
  0x4c   : > { %981 = vperm.xlu1 %1985, %v953_v48  }
  0x4d   : > { %1816 = vmatmul.mubr.msk.f32.gmra.mxu0 %vm405_vm1, %v342_v49 }
  0x4e   : > { %1828 = vmatmul.mubr.msk.f32.gmra.mxu1 %vm405_vm1, %v342_v49  ;;  %561 = vmatprep.mubr.f32.mxu0 %v2368_v13 }
  0x4f   : > { %686 = vmatprep.mubr.f32.mxu1 %v2368_v13  ;;  %986 = vperm.xlu0 %1984, %v954_v50  }
  0x50   : > { %971 = vperm.xlu1 %1985, %v951_v51  }
  0x51   : > { %1817 = vmatmul.mubr.msk.f32.gmra.mxu0 %vm405_vm1, %v343_v52 }
  0x52   : > { %1829 = vmatmul.mubr.msk.f32.gmra.mxu1 %vm405_vm1, %v343_v52  ;;  %567 = vmatprep.mubr.f32.mxu0 %v2368_v13 }
  0x53   : > { %692 = vmatprep.mubr.f32.mxu1 %v2368_v13  ;;  %976 = vperm.xlu0 %1984, %v952_v53  }
  0x54   : > { %961 = vperm.xlu1 %1985, %v949_v54  }
  0x55   : > { %1818 = vmatmul.mubr.msk.f32.gmra.mxu0 %vm405_vm1, %v344_v55 }
  0x56   : > { %1830 = vmatmul.mubr.msk.f32.gmra.mxu1 %vm405_vm1, %v344_v55  ;;  %1104 = vmatprep.mubr.f32.mxu0 %v2368_v13 }
  0x57   : > { %1229 = vmatprep.mubr.f32.mxu1 %v2368_v13  ;;  %966 = vperm.xlu0 %1984, %v950_v56  }
  0x5b   : > { %1534 = vperm.xlu0 %1984, %v1531_v57  }
  0xa6   : > { %v2611_v58 = vpop.permute.xlu1 %392 }
  0xae   : > { %v2613_v59 = vpop.permute.xlu0 %402 }
  0xaf   : > { %v2615_v60 = vpop.permute.xlu1 %387 }
  0xb2   : > { %v2617_v63 = vpop.permute.xlu0 %397 }
  0xb3   : > { %v2619_v4 = vpop.permute.xlu1 %377 }
  0xb6   : > { %v2621_v7 = vpop.permute.xlu0 %382 }
  0xb7   : > { %v368_v12 = vpop.permute.xlu1 %367 }
  0xba   : > { %v373_v15 = vpop.permute.xlu0 %372 }
  0xbb   : > { %v358_v18 = vpop.permute.xlu1 %357 }
  0xbe   : > { %v363_v20 = vpop.permute.xlu0 %362 }
  0xf1   : > { %v515_v61 = vpop.f32.mrf.mxu0 }
  0xf2   : > { %v640_v62 = vpop.f32.mrf.mxu1  ;;  %v516_v21 = vadd.f32 %v515_v61, %v358_v18 }
  0xf3   : > { %v517_v0 = vpop.f32.mrf.mxu0  ;;  %v641_v43 = vadd.f32 %v640_v62, %v358_v18 }
  0xf4   : > { %v642_v1 = vpop.f32.mrf.mxu1  ;;  %v518_v23 = vadd.f32 %v517_v0, %v358_v18  ;;  %v1831_v27 = vmul.f32 -1.442695, %v516_v21 }
  0xf5   : > { %v521_v2 = vpop.f32.mrf.mxu0  ;;  %v643_v45 = vadd.f32 %v642_v1, %v358_v18  ;;  %v1833_v49 = vmul.f32 -1.442695, %v641_v43 }
  0xf6   : > { %v646_v3 = vpop.f32.mrf.mxu1  ;;  %v522_v25 = vadd.f32 %v521_v2, %v363_v20  ;;  %v1832_v30 = vmul.f32 -1.442695, %v518_v23  ;;  %1986 = vpow2.f32 %v1831_v27 }
  0xf7   : > { %v523_v5 = vpop.f32.mrf.mxu0  ;;  %v647_v47 = vadd.f32 %v646_v3, %v363_v20  ;;  %v1834_v52 = vmul.f32 -1.442695, %v643_v45 }
  0xf8   : > { %v648_v6 = vpop.f32.mrf.mxu1  ;;  %v524_v26 = vadd.f32 %v523_v5, %v363_v20  ;;  %v1835_v33 = vmul.f32 -1.442695, %v522_v25  ;;  %1988 = vpow2.f32 %v1832_v30 }
  0xf9   : > { %v527_v8 = vpop.f32.mrf.mxu0  ;;  %v649_v48 = vadd.f32 %v648_v6, %v363_v20  ;;  %v1837_v55 = vmul.f32 -1.442695, %v647_v47 }
  0xfa   : > { %v652_v9 = vpop.f32.mrf.mxu1  ;;  %v528_v28 = vadd.f32 %v527_v8, %v368_v12  ;;  %v1836_v35 = vmul.f32 -1.442695, %v524_v26  ;;  %1990 = vpow2.f32 %v1835_v33 }
  0xfb   : > { %v529_v10 = vpop.f32.mrf.mxu0  ;;  %v653_v50 = vadd.f32 %v652_v9, %v368_v12  ;;  %v1838_v57 = vmul.f32 -1.442695, %v649_v48 }
  0xfc   : > { %v654_v11 = vpop.f32.mrf.mxu1  ;;  %v530_v31 = vadd.f32 %v529_v10, %v368_v12  ;;  %v1839_v37 = vmul.f32 -1.442695, %v528_v28  ;;  %1992 = vpow2.f32 %v1836_v35 }
  0xfd   : > { %v533_v14 = vpop.f32.mrf.mxu0  ;;  %v655_v53 = vadd.f32 %v654_v11, %v368_v12  ;;  %v1841_v62 = vmul.f32 -1.442695, %v653_v50 }
  0xfe   : > { %v658_v16 = vpop.f32.mrf.mxu1  ;;  %v534_v34 = vadd.f32 %v533_v14, %v373_v15  ;;  %v1840_v39 = vmul.f32 -1.442695, %v530_v31  ;;  %1994 = vpow2.f32 %v1839_v37 }
  0xff   : > { %v535_v17 = vpop.f32.mrf.mxu0  ;;  %v659_v56 = vadd.f32 %v658_v16, %v373_v15  ;;  %v1842_v2 = vmul.f32 -1.442695, %v655_v53 }
 0x100   : > { %v660_v19 = vpop.f32.mrf.mxu1  ;;  %v536_v36 = vadd.f32 %v535_v17, %v373_v15  ;;  %v1843_v41 = vmul.f32 -1.442695, %v534_v34  ;;  %1996 = vpow2.f32 %v1840_v39 }
 0x101   : > { %v2623_v22 = vpop.f32.mrf.mxu0  ;;  %v661_v61 = vadd.f32 %v660_v19, %v373_v15  ;;  %v1845_v6 = vmul.f32 -1.442695, %v659_v56 }
 0x102   : > { %v2625_v24 = vpop.f32.mrf.mxu1  ;;  %v1844_v42 = vmul.f32 -1.442695, %v536_v36  ;;  %1998 = vpow2.f32 %v1843_v41  ;;  %v540_v25 = vadd.f32 %v2623_v22, %v2619_v4 }
 0x103   : > { %v2627_v29 = vpop.f32.mrf.mxu0  ;;  %v1987_v1 = vpop.eup %1986  ;;  %v1846_v9 = vmul.f32 -1.442695, %v661_v61  ;;  %v665_v28 = vadd.f32 %v2625_v24, %v2619_v4 }
 0x104   : > { %v2629_v32 = vpop.f32.mrf.mxu1  ;;  %2000 = vpow2.f32 %v1844_v42  ;;  %v819_v11 = vadd.f32 1.0, %v1987_v1  ;;  %v542_v33 = vadd.f32 %v2627_v29, %v2619_v4  ;;  %v1847_v36 = vmul.f32 -1.442695, %v540_v25 }
 0x105   : > { %v2631_v38 = vpop.f32.mrf.mxu0  ;;  %2002 = vpow2.f32 %v1833_v49  ;;  %v1989_v5 = vpop.eup %1988  ;;  %v667_v35 = vadd.f32 %v2629_v32, %v2619_v4  ;;  %v1849_v24 = vmul.f32 -1.442695, %v665_v28 }
 0x106   : > { %v2633_v40 = vpop.f32.mrf.mxu1  ;;  %2004 = vpow2.f32 %v1834_v52  ;;  %v820_v15 = vadd.f32 1.0, %v1989_v5  ;;  %v546_v22 = vadd.f32 %v2631_v38, %v2621_v7  ;;  %v1848_v43 = vmul.f32 -1.442695, %v542_v33 }
 0x107   : > { %v2635_v44 = vpop.f32.mrf.mxu0  ;;  %2006 = vpow2.f32 %v1837_v55  ;;  %v1991_v8 = vpop.eup %1990  ;;  %v671_v41 = vadd.f32 %v2633_v40, %v2621_v7  ;;  %v1850_v38 = vmul.f32 -1.442695, %v667_v35 }
 0x108   : > { %v2637_v46 = vpop.f32.mrf.mxu1  ;;  %2008 = vpow2.f32 %v1838_v57  ;;  %v823_v18 = vadd.f32 1.0, %v1991_v8  ;;  %v548_v4 = vadd.f32 %v2635_v44, %v2621_v7  ;;  %v1851_v48 = vmul.f32 -1.442695, %v546_v22 }
 0x109   : > { %v2639_v51 = vpop.f32.mrf.mxu0  ;;  %v1993_v10 = vpop.eup %1992  ;;  %2010 = vpow2.f32 %v1841_v62  ;;  %v673_v45 = vadd.f32 %v2637_v46, %v2621_v7  ;;  %v1853_v52 = vmul.f32 -1.442695, %v671_v41 }
 0x10a   : > { %v2641_v54 = vpop.f32.mrf.mxu1  ;;  %2012 = vpow2.f32 %v1842_v2  ;;  %v824_v20 = vadd.f32 1.0, %v1993_v10  ;;  %v552_v40 = vadd.f32 %v2639_v51, %v2615_v60  ;;  %v1852_v7 = vmul.f32 -1.442695, %v548_v4 }
 0x10b   : > { %v2643_v0 = vpop.f32.mrf.mxu0  ;;  %v1995_v14 = vpop.eup %1994  ;;  %2014 = vpow2.f32 %v1845_v6  ;;  %v1854_v57 = vmul.f32 -1.442695, %v673_v45 }
 0x10c   : > { %v2645_v3 = vpop.f32.mrf.mxu1  ;;  %2016 = vpow2.f32 %v1846_v9  ;;  %v827_v23 = vadd.f32 1.0, %v1995_v14  ;;  %v554_v44 = vadd.f32 %v2643_v0, %v2615_v60  ;;  %v1855_v62 = vmul.f32 -1.442695, %v552_v40 }
 0x10d   : > { %v557_v12 = vpop.f32.mrf.mxu0  ;;  %v1997_v17 = vpop.eup %1996  ;;  %2018 = vrcp.f32 %v819_v11 }
 0x10e   : > { %v2647_v16 = vpop.f32.mrf.mxu1  ;;  %2020 = vrcp.f32 %v820_v15  ;;  %v828_v27 = vadd.f32 1.0, %v1997_v17  ;;  %v558_v46 = vadd.f32 %v557_v12, %v2611_v58  ;;  %v1856_v5 = vmul.f32 -1.442695, %v554_v44 }
 0x10f   : > { %v1999_v19 = vpop.eup %1998  ;;  %v559_v26 = vpop.f32.mrf.mxu0  ;;  %2022 = vrcp.f32 %v823_v18 }
 0x110   : > { %v684_v30 = vpop.f32.mrf.mxu1  ;;  %v831_v31 = vadd.f32 1.0, %v1999_v19  ;;  %2024 = vrcp.f32 %v824_v20  ;;  %v560_v51 = vadd.f32 %v559_v26, %v2611_v58  ;;  %v1859_v10 = vmul.f32 -1.442695, %v558_v46 }
 0x111   : > { %v2001_v21 = vpop.eup %2000  ;;  %2026 = vrcp.f32 %v827_v23  ;;  %v563_v37 = vpop.f32.mrf.mxu0  ;;  %v685_v1 = vadd.f32 %v684_v30, %v2611_v58 }
 0x112   : > { %v832_v34 = vadd.f32 1.0, %v2001_v21  ;;  %v2659_v39 = vpop.eup %2002  ;;  %2028 = vrcp.f32 %v828_v27  ;;  %v688_v42 = vpop.f32.mrf.mxu1  ;;  %v564_v6 = vadd.f32 %v563_v37, %v2617_v63  ;;  %v1860_v14 = vmul.f32 -1.442695, %v560_v51 }
 0x113   : > { %v2663_v29 = vpop.eup %2004  ;;  %2030 = vrcp.f32 %v831_v31  ;;  %v565_v49 = vpop.f32.mrf.mxu0  ;;  %v689_v11 = vadd.f32 %v688_v42, %v2617_v63  ;;  %v1862_v18 = vmul.f32 -1.442695, %v685_v1  ;;  %v683_v37 = vadd.f32 %v2647_v16, %v2611_v58 }
 0x114   : > { %v2667_v32 = vpop.eup %2006  ;;  %2032 = vrcp.f32 %v832_v34  ;;  %v690_v53 = vpop.f32.mrf.mxu1  ;;  %v566_v15 = vadd.f32 %v565_v49, %v2617_v63  ;;  %v1863_v23 = vmul.f32 -1.442695, %v564_v6  ;;  %v679_v42 = vadd.f32 %v2645_v3, %v2615_v60 }
 0x115   : > { %v2671_v47 = vpop.eup %2008  ;;  %2034 = vpow2.f32 %v1847_v36  ;;  %v569_v0 = vpop.f32.mrf.mxu0  ;;  %v691_v19 = vadd.f32 %v690_v53, %v2617_v63  ;;  %v1865_v28 = vmul.f32 -1.442695, %v689_v11  ;;  %v1861_v16 = vmul.f32 -1.442695, %v683_v37 }
 0x116   : > { %v2675_v50 = vpop.eup %2010  ;;  %2036 = vpow2.f32 %v1849_v24  ;;  %v694_v8 = vpop.f32.mrf.mxu1  ;;  %v570_v25 = vadd.f32 %v569_v0, %v2613_v59  ;;  %v1864_v33 = vmul.f32 -1.442695, %v566_v15  ;;  %v1858_v49 = vmul.f32 -1.442695, %v679_v42 }
 0x117   : > { %v2679_v55 = vpop.eup %2012  ;;  %2038 = vpow2.f32 %v1848_v43  ;;  %v571_v20 = vpop.f32.mrf.mxu0  ;;  %v695_v30 = vadd.f32 %v694_v8, %v2613_v59  ;;  %v1866_v35 = vmul.f32 -1.442695, %v691_v19 }
 0x118   : > { %v2682_v56 = vpop.eup %2014  ;;  %2040 = vpow2.f32 %v1850_v38  ;;  %v696_v26 = vpop.f32.mrf.mxu1  ;;  %v572_v63 = vadd.f32 %v571_v20, %v2613_v59  ;;  %v1867_v24 = vmul.f32 -1.442695, %v570_v25  ;;  %v677_v38 = vadd.f32 %v2641_v54, %v2615_v60 }
 0x119   : > { %v2685_v61 = vpop.eup %2016  ;;  %2042 = vpow2.f32 %v1851_v48  ;;  %v697_v36 = vadd.f32 %v696_v26, %v2613_v59  ;;  %v1869_v43 = vmul.f32 -1.442695, %v695_v30 }
 0x11a   : > { %v2688_v2 = vpop.eup %2018  ;;  %2044 = vpow2.f32 %v1853_v52  ;;  %v1868_v45 = vmul.f32 -1.442695, %v572_v63  ;;  %v1857_v52 = vmul.f32 -1.442695, %v677_v38 }
 0x11b   : > { %v2691_v9 = vpop.eup %2020  ;;  %2046 = vpow2.f32 %v1852_v7  ;;  %v1870_v48 = vmul.f32 -1.442695, %v697_v36 }
 0x11c   : > { %v2694_v12 = vpop.eup %2022  ;;  %2048 = vpow2.f32 %v1854_v57 }
 0x11d   : > { %v2697_v17 = vpop.eup %2024  ;;  %2050 = vpow2.f32 %v1855_v62 }
 0x11e   : > { %v2700_v21 = vpop.eup %2026  ;;  %2052 = vpow2.f32 %v1856_v5 }
 0x11f   : > { %v2703_v27 = vpop.eup %2028  ;;  %2054 = vpow2.f32 %v1859_v10 }
 0x120   : > { %v2706_v31 = vpop.eup %2030  ;;  %2056 = vpow2.f32 %v1860_v14 }
 0x121   : > { %v2709_v34 = vpop.eup %2032  ;;  %2058 = vpow2.f32 %v1862_v18 }
 0x122   : > { %v2035_v22 = vpop.eup %2034  ;;  %2060 = vpow2.f32 %v1863_v23 }
 0x123   : > { %v2714_v41 = vpop.eup %2036  ;;  %2062 = vpow2.f32 %v1865_v28  ;;  %v835_v53 = vadd.f32 1.0, %v2035_v22 }
 0x124   : > { %v2039_v4 = vpop.eup %2038  ;;  %2064 = vpow2.f32 %v1864_v33 }
 0x125   : > { %v2720_v59 = vpop.eup %2040  ;;  %2066 = vpow2.f32 %v1866_v35  ;;  %v836_v54 = vadd.f32 1.0, %v2039_v4 }
 0x126   : > { %v2043_v58 = vpop.eup %2042  ;;  %2068 = vpow2.f32 %v1867_v24 }
 0x127   : > { %v2722_v40 = vpop.eup %2044  ;;  %2070 = vpow2.f32 %v1869_v43  ;;  %v839_v46 = vadd.f32 1.0, %v2043_v58 }
 0x128   : > { %v2047_v3 = vpop.eup %2046  ;;  %2072 = vpow2.f32 %v1868_v45 }
 0x129   : > { %v2049_v44 = vpop.eup %2048  ;;  %2074 = vpow2.f32 %v1870_v48  ;;  %v840_v51 = vadd.f32 1.0, %v2047_v3 }
 0x12a   : > { %v2051_v60 = vpop.eup %2050  ;;  %2076 = vpow2.f32 %v1861_v16 }
 0x12b   : > { %v2053_v7 = vpop.eup %2052  ;;  %2078 = vpow2.f32 %v1858_v49  ;;  %v843_v1 = vadd.f32 1.0, %v2051_v60  ;;  %v842_v49 = vadd.f32 1.0, %v2049_v44  ;;  %v838_v60 = vadd.f32 1.0, %v2720_v59 }
 0x12c   : > { %v2055_v57 = vpop.eup %2054  ;;  %2080 = vpow2.f32 %v1857_v52  ;;  %v844_v5 = vadd.f32 1.0, %v2053_v7  ;;  %v841_v52 = vadd.f32 1.0, %v2722_v40  ;;  %v837_v7 = vadd.f32 1.0, %v2714_v41 }
 0x12d   : > { %v2057_v62 = vpop.eup %2056  ;;  %2082 = vrcp.f32 %v835_v53  ;;  %v847_v8 = vadd.f32 1.0, %v2055_v57  ;;  %v834_v57 = vadd.f32 1.0, %v2685_v61  ;;  %v833_v44 = vadd.f32 1.0, %v2682_v56 }
 0x12e   : > { %v2059_v0 = vpop.eup %2058  ;;  %2084 = vrcp.f32 %v836_v54  ;;  %v848_v11 = vadd.f32 1.0, %v2057_v62  ;;  %v830_v40 = vadd.f32 1.0, %v2679_v55  ;;  %v829_v59 = vadd.f32 1.0, %v2675_v50 }
 0x12f   : > { %v2061_v6 = vpop.eup %2060  ;;  %2086 = vrcp.f32 %v839_v46  ;;  %v850_v42 = vadd.f32 1.0, %v2059_v0  ;;  %v826_v41 = vadd.f32 1.0, %v2671_v47  ;;  %v825_v61 = vadd.f32 1.0, %v2667_v32 }
 0x130   : > { %v2063_v10 = vpop.eup %2062  ;;  %2088 = vrcp.f32 %v840_v51  ;;  %v851_v15 = vadd.f32 1.0, %v2061_v6  ;;  %v822_v56 = vadd.f32 1.0, %v2663_v29 }
 0x131   : > { %v2065_v14 = vpop.eup %2064  ;;  %2090 = vrcp.f32 %v843_v1  ;;  %v853_v37 = vadd.f32 1.0, %v2063_v10 }
 0x132   : > { %v2067_v18 = vpop.eup %2066  ;;  %2092 = vrcp.f32 %v844_v5  ;;  %v852_v19 = vadd.f32 1.0, %v2065_v14 }
 0x133   : > { %v2069_v20 = vpop.eup %2068  ;;  %2094 = vrcp.f32 %v847_v8  ;;  %v854_v35 = vadd.f32 1.0, %v2067_v18  ;;  %v821_v8 = vadd.f32 1.0, %v2659_v39 }
 0x134   : > { %v2071_v23 = vpop.eup %2070  ;;  %2096 = vrcp.f32 %v848_v11  ;;  %v855_v25 = vadd.f32 1.0, %v2069_v20 }
 0x135   : > { %v2073_v26 = vpop.eup %2072  ;;  %2098 = vrcp.f32 %v851_v15  ;;  %v857_v30 = vadd.f32 1.0, %v2071_v23 }
 0x136   : > { %v2075_v28 = vpop.eup %2074  ;;  %2100 = vrcp.f32 %v852_v19  ;;  %v856_v33 = vadd.f32 1.0, %v2073_v26 }
 0x137   : > { %v2077_v63 = vpop.eup %2076  ;;  %2102 = vrcp.f32 %v855_v25  ;;  %v858_v36 = vadd.f32 1.0, %v2075_v28  ;;  %v945_v28 = vld [vmem:[%s3008_s3 + $0x30] sm:$0xff] }
 0x138   : > { %v2079_v22 = vpop.eup %2078  ;;  %2104 = vrcp.f32 %v856_v33  ;;  %v849_v4 = vadd.f32 1.0, %v2077_v63  ;;  %v947_v33 = vld [vmem:[%s3008_s3 + $0x40] sm:$0xff]  ;;  %v948_v63 = vld [vmem:[%s3008_s3 + $0x48] sm:$0xff] }
 0x139   : > { %v2081_v24 = vpop.eup %2080  ;;  %2106 = vrcp.f32 %v858_v36  ;;  %v846_v45 = vadd.f32 1.0, %v2079_v22  ;;  %v2824_v36 = vpop.permute.xlu0 %1006 }
 0x13a   : > { %v2724_v43 = vpop.eup %2082  ;;  %2108 = vrcp.f32 %v857_v30  ;;  %v845_v58 = vadd.f32 1.0, %v2081_v24  ;;  %v946_v30 = vld [vmem:[%s3008_s3 + $0x38] sm:$0xff] }
 0x13b   : > { %v2726_v38 = vpop.eup %2084  ;;  %2110 = vrcp.f32 %v854_v35  ;;  %v2822_v35 = vpop.permute.xlu1 %1001 }
 0x13c   : > { %v2728_v48 = vpop.eup %2086  ;;  %2112 = vrcp.f32 %v853_v37 }
 0x13d   : > { %v2089_v16 = vpop.eup %2088  ;;  %2114 = vrcp.f32 %v850_v42 }
 0x13e   : > { %v2091_v3 = vpop.eup %2090  ;;  %2116 = vrcp.f32 %v849_v4 }
 0x13f   : > { %v2093_v53 = vpop.eup %2092  ;;  %2118 = vrcp.f32 %v846_v45  ;;  %v2826_v37 = vpop.permute.xlu1 %991 }
 0x140   : > { %v2095_v54 = vpop.eup %2094  ;;  %2120 = vrcp.f32 %v845_v58 }
 0x141   : > { %v2097_v46 = vpop.eup %2096  ;;  %2122 = vrcp.f32 %v842_v49 }
 0x142   : > { %v2099_v51 = vpop.eup %2098  ;;  %2124 = vrcp.f32 %v841_v52 }
 0x143   : > { %v2101_v62 = vpop.eup %2100  ;;  %2126 = vrcp.f32 %v838_v60  ;;  %v2830_v58 = vpop.permute.xlu1 %981 }
 0x144   : > { %v2103_v1 = vpop.eup %2102  ;;  %2128 = vrcp.f32 %v837_v7 }
 0x145   : > { %v2105_v0 = vpop.eup %2104  ;;  %2130 = vrcp.f32 %v834_v57 }
 0x146   : > { %v2107_v5 = vpop.eup %2106  ;;  %2132 = vrcp.f32 %v833_v44  ;;  %1052 = vmatprep.subr.mxu0 %v2105_v0 }
 0x147   : > { %v2109_v6 = vpop.eup %2108  ;;  %2134 = vrcp.f32 %v830_v40  ;;  %1177 = vmatprep.subr.mxu1 %v2107_v5  ;;  %1053 = vmatpush1.msra.mxu0 %v2103_v1 }
 0x148   : > { %v2111_v55 = vpop.eup %2110  ;;  %2136 = vrcp.f32 %v829_v59  ;;  %1178 = vmatpush1.msra.mxu1 %v2109_v6  ;;  %1054 = vmatprep.subr.mxu0 %v2101_v62 }
 0x149   : > { %v2113_v50 = vpop.eup %2112  ;;  %2138 = vrcp.f32 %v826_v41  ;;  %1179 = vmatprep.subr.mxu1 %v2111_v55  ;;  %1055 = vmatpush1.msra.mxu0 %v2099_v51 }
 0x14a   : > { %v2115_v47 = vpop.eup %2114  ;;  %2140 = vrcp.f32 %v825_v61  ;;  %1180 = vmatpush1.msra.mxu1 %v2113_v50  ;;  %1056 = vmatprep.subr.mxu0 %v2097_v46 }
 0x14b   : > { %v2117_v32 = vpop.eup %2116  ;;  %2142 = vrcp.f32 %v822_v56  ;;  %1181 = vmatprep.subr.mxu1 %v2115_v47  ;;  %1057 = vmatpush1.msra.mxu0 %v2095_v54  ;;  %v972_v54 = vpop.permute.xlu1 %971 }
 0x14c   : > { %v2119_v29 = vpop.eup %2118  ;;  %2144 = vrcp.f32 %v821_v8  ;;  %1182 = vmatpush1.msra.mxu1 %v2117_v32  ;;  %1058 = vmatprep.subr.mxu0 %v2093_v53 }
 0x14d   : > { %v2121_v39 = vpop.eup %2120  ;;  %1183 = vmatprep.subr.mxu1 %v2119_v29  ;;  %1059 = vmatpush1.msra.mxu0 %v2091_v3 }
 0x14e   : > { %v2123_v10 = vpop.eup %2122  ;;  %1184 = vmatpush1.msra.mxu1 %v2121_v39  ;;  %1060 = vmatprep.subr.mxu0 %v2089_v16 }
 0x14f   : > { %v2125_v11 = vpop.eup %2124  ;;  %1185 = vmatprep.subr.mxu1 %v2123_v10  ;;  %1061 = vmatpush1.msra.mxu0 %v2728_v48  ;;  %v962_v44 = vpop.permute.xlu1 %961 }
 0x150   : > { %v2127_v14 = vpop.eup %2126  ;;  %1186 = vmatpush1.msra.mxu1 %v2125_v11  ;;  %1062 = vmatprep.subr.mxu0 %v2726_v38 }
 0x151   : > { %v2129_v15 = vpop.eup %2128  ;;  %1187 = vmatprep.subr.mxu1 %v2127_v14  ;;  %1063 = vmatpush1.msra.mxu0 %v2724_v43  ;;  %v2828_v43 = vpop.permute.xlu0 %996 }
 0x152   : > { %v2131_v18 = vpop.eup %2130  ;;  %1188 = vmatpush1.msra.mxu1 %v2129_v15  ;;  %1064 = vmatprep.subr.mxu0 %v2709_v34 }
 0x153   : > { %v2133_v19 = vpop.eup %2132  ;;  %1189 = vmatprep.subr.mxu1 %v2131_v18  ;;  %1065 = vmatpush1.msra.mxu0 %v2706_v31  ;;  %v939_v31 = vld [vmem:[%s3008_s3] sm:$0xff] }
 0x154   : > { %v2135_v20 = vpop.eup %2134  ;;  %1190 = vmatpush1.msra.mxu1 %v2133_v19  ;;  %1066 = vmatprep.subr.mxu0 %v2703_v27 }
 0x155   : > { %v2137_v23 = vpop.eup %2136  ;;  %1191 = vmatprep.subr.mxu1 %v2135_v20  ;;  %1067 = vmatpush1.msra.mxu0 %v2700_v21  ;;  %v944_v21 = vld [vmem:[%s3008_s3 + $0x28] sm:$0xff] }
 0x156   : > { %v2139_v25 = vpop.eup %2138  ;;  %1192 = vmatpush1.msra.mxu1 %v2137_v23  ;;  %1068 = vmatprep.subr.mxu0 %v2697_v17  ;;  %v943_v17 = vld [vmem:[%s3008_s3 + $0x20] sm:$0xff] }
 0x157   : > { %v2141_v26 = vpop.eup %2140  ;;  %1193 = vmatprep.subr.mxu1 %v2139_v25  ;;  %1069 = vmatpush1.msra.mxu0 %v2694_v12  ;;  %v940_v12 = vld [vmem:[%s3008_s3 + $0x8] sm:$0xff] }
 0x158   : > { %v2143_v34 = vpop.eup %2142  ;;  %1194 = vmatpush1.msra.mxu1 %v2141_v26  ;;  %1070 = vmatprep.subr.mxu0 %v2691_v9  ;;  %v942_v9 = vld [vmem:[%s3008_s3 + $0x18] sm:$0xff] }
 0x159   : > { %v2145_v27 = vpop.eup %2144  ;;  %1195 = vmatprep.subr.mxu1 %v2143_v34  ;;  %1071 = vmatpush1.msra.mxu0 %v2688_v2  ;;  %v941_v2 = vld [vmem:[%s3008_s3 + $0x10] sm:$0xff] }
 0x15a   : > { %1196 = vmatpush1.msra.mxu1 %v2145_v27  ;;  %1871 = vmatmul.mubr.msk.f32.vlgmr.msra.gmra.mxu0 %vm1009_vm2, %v939_v31 }
 0x15b   : > { %1881 = vmatmul.mubr.msk.f32.vlgmr.msra.gmra.mxu1 %vm1009_vm2, %v939_v31  ;;  %1110 = vmatprep.mubr.f32.mxu0 %v2368_v13 }
 0x15c   : > { %1235 = vmatprep.mubr.f32.mxu1 %v2368_v13 }
 0x15e   : > { %1872 = vmatmul.mubr.msk.f32.gmra.mxu0 %vm1009_vm2, %v940_v12 }
 0x15f   : > { %1882 = vmatmul.mubr.msk.f32.gmra.mxu1 %vm1009_vm2, %v940_v12  ;;  %1116 = vmatprep.mubr.f32.mxu0 %v2368_v13 }
 0x160   : > { %1241 = vmatprep.mubr.f32.mxu1 %v2368_v13 }
 0x162   : > { %1873 = vmatmul.mubr.msk.f32.gmra.mxu0 %vm1009_vm2, %v941_v2 }
 0x163   : > { %1883 = vmatmul.mubr.msk.f32.gmra.mxu1 %vm1009_vm2, %v941_v2  ;;  %1122 = vmatprep.mubr.f32.mxu0 %v2368_v13 }
 0x164   : > { %1247 = vmatprep.mubr.f32.mxu1 %v2368_v13 }
 0x166   : > { %1874 = vmatmul.mubr.msk.f32.gmra.mxu0 %vm1009_vm2, %v942_v9 }
 0x167   : > { %1884 = vmatmul.mubr.msk.f32.gmra.mxu1 %vm1009_vm2, %v942_v9  ;;  %1128 = vmatprep.mubr.f32.mxu0 %v2368_v13 }
 0x168   : > { %1253 = vmatprep.mubr.f32.mxu1 %v2368_v13 }
 0x16a   : > { %1875 = vmatmul.mubr.msk.f32.gmra.mxu0 %vm1009_vm2, %v943_v17 }
 0x16b   : > { %1885 = vmatmul.mubr.msk.f32.gmra.mxu1 %vm1009_vm2, %v943_v17  ;;  %1134 = vmatprep.mubr.f32.mxu0 %v2368_v13 }
 0x16c   : > { %1259 = vmatprep.mubr.f32.mxu1 %v2368_v13 }
 0x16e   : > { %1876 = vmatmul.mubr.msk.f32.gmra.mxu0 %vm1009_vm2, %v944_v21 }
 0x16f   : > { %1886 = vmatmul.mubr.msk.f32.gmra.mxu1 %vm1009_vm2, %v944_v21  ;;  %1140 = vmatprep.mubr.f32.mxu0 %v2368_v13 }
 0x170   : > { %1265 = vmatprep.mubr.f32.mxu1 %v2368_v13 }
 0x172   : > { %1877 = vmatmul.mubr.msk.f32.gmra.mxu0 %vm1009_vm2, %v945_v28 }
 0x173   : > { %1887 = vmatmul.mubr.msk.f32.gmra.mxu1 %vm1009_vm2, %v945_v28  ;;  %1146 = vmatprep.mubr.f32.mxu0 %v2368_v13 }
 0x174   : > { %1271 = vmatprep.mubr.f32.mxu1 %v2368_v13 }
 0x176   : > { %1878 = vmatmul.mubr.msk.f32.gmra.mxu0 %vm1009_vm2, %v946_v30 }
 0x177   : > { %1888 = vmatmul.mubr.msk.f32.gmra.mxu1 %vm1009_vm2, %v946_v30  ;;  %1152 = vmatprep.mubr.f32.mxu0 %v2368_v13 }
 0x178   : > { %1277 = vmatprep.mubr.f32.mxu1 %v2368_v13 }
 0x17a   : > { %1879 = vmatmul.mubr.msk.f32.gmra.mxu0 %vm1009_vm2, %v947_v33 }
 0x17b   : > { %1889 = vmatmul.mubr.msk.f32.gmra.mxu1 %vm1009_vm2, %v947_v33  ;;  %1158 = vmatprep.mubr.f32.mxu0 %v2368_v13 }
 0x17c   : > { %1283 = vmatprep.mubr.f32.mxu1 %v2368_v13 }
 0x17e   : > { %1880 = vmatmul.mubr.msk.f32.gmra.mxu0 %vm1009_vm2, %v948_v63 }
 0x17f   : > { %1890 = vmatmul.mubr.msk.f32.gmra.mxu1 %vm1009_vm2, %v948_v63  ;;  %1608 = vmatprep.mubr.f32.mxu0 %v2368_v13 }
 0x180   : > { %1679 = vmatprep.mubr.f32.mxu1 %v2368_v13  ;;  %v2832_v13 = vpop.permute.xlu0 %986 }
 0x184   : > { %v977_v46 = vpop.permute.xlu0 %976 }
 0x188   : > { %v967_v1 = vpop.permute.xlu0 %966 }
 0x21a   : > { %v1106_v22 = vpop.f32.mrf.mxu0 }
 0x21b   : > { %v1231_v24 = vpop.f32.mrf.mxu1  ;;  %v1107_v62 = vadd.f32 %v1106_v22, %v962_v44 }
 0x21c   : > { %v1108_v42 = vpop.f32.mrf.mxu0  ;;  %v1232_v20 = vadd.f32 %v1231_v24, %v962_v44 }
 0x21d   : > { %v1233_v4 = vpop.f32.mrf.mxu1  ;;  %v1109_v59 = vadd.f32 %v1108_v42, %v962_v44  ;;  %v1891_v61 = vmul.f32 -1.442695, %v1107_v62 }
 0x21e   : > { %v1112_v38 = vpop.f32.mrf.mxu0  ;;  %v1234_v25 = vadd.f32 %v1233_v4, %v962_v44  ;;  %v1893_v27 = vmul.f32 -1.442695, %v1232_v20 }
 0x21f   : > { %v1237_v45 = vpop.f32.mrf.mxu1  ;;  %v1113_v41 = vadd.f32 %v1112_v38, %v967_v1  ;;  %v1892_v55 = vmul.f32 -1.442695, %v1109_v59  ;;  %2146 = vpow2.f32 %v1891_v61 }
 0x220   : > { %v1114_v48 = vpop.f32.mrf.mxu0  ;;  %v1238_v31 = vadd.f32 %v1237_v45, %v967_v1  ;;  %v1894_v9 = vmul.f32 -1.442695, %v1234_v25 }
 0x221   : > { %v1239_v16 = vpop.f32.mrf.mxu1  ;;  %v1115_v5 = vadd.f32 %v1114_v48, %v967_v1  ;;  %v1895_v47 = vmul.f32 -1.442695, %v1113_v41  ;;  %2148 = vpow2.f32 %v1892_v55 }
 0x222   : > { %v1118_v49 = vpop.f32.mrf.mxu0  ;;  %v1240_v34 = vadd.f32 %v1239_v16, %v967_v1  ;;  %v1897_v28 = vmul.f32 -1.442695, %v1238_v31 }
 0x223   : > { %v1243_v3 = vpop.f32.mrf.mxu1  ;;  %v1119_v6 = vadd.f32 %v1118_v49, %v972_v54  ;;  %v1896_v29 = vmul.f32 -1.442695, %v1115_v5  ;;  %2150 = vpow2.f32 %v1895_v47 }
 0x224   : > { %v1120_v52 = vpop.f32.mrf.mxu0  ;;  %v1244_v12 = vadd.f32 %v1243_v3, %v972_v54  ;;  %v1898_v33 = vmul.f32 -1.442695, %v1240_v34 }
 0x225   : > { %v1245_v53 = vpop.f32.mrf.mxu1  ;;  %v1121_v8 = vadd.f32 %v1120_v52, %v972_v54  ;;  %v1899_v10 = vmul.f32 -1.442695, %v1119_v6  ;;  %2152 = vpow2.f32 %v1896_v29 }
 0x226   : > { %v1124_v60 = vpop.f32.mrf.mxu0  ;;  %v1246_v17 = vadd.f32 %v1245_v53, %v972_v54  ;;  %v1901_v22 = vmul.f32 -1.442695, %v1244_v12 }
 0x227   : > { %v1249_v7 = vpop.f32.mrf.mxu1  ;;  %v1125_v32 = vadd.f32 %v1124_v60, %v977_v46  ;;  %v1900_v14 = vmul.f32 -1.442695, %v1121_v8  ;;  %2154 = vpow2.f32 %v1899_v10 }
 0x228   : > { %v1126_v57 = vpop.f32.mrf.mxu0  ;;  %v1250_v30 = vadd.f32 %v1249_v7, %v977_v46  ;;  %v1902_v4 = vmul.f32 -1.442695, %v1246_v17 }
 0x229   : > { %v1251_v51 = vpop.f32.mrf.mxu1  ;;  %v1127_v39 = vadd.f32 %v1126_v57, %v977_v46  ;;  %v1903_v18 = vmul.f32 -1.442695, %v1125_v32  ;;  %2156 = vpow2.f32 %v1900_v14 }
 0x22a   : > { %v2834_v40 = vpop.f32.mrf.mxu0  ;;  %v1252_v63 = vadd.f32 %v1251_v51, %v977_v46  ;;  %v1905_v48 = vmul.f32 -1.442695, %v1250_v30 }
 0x22b   : > { %v2836_v0 = vpop.f32.mrf.mxu1  ;;  %v1904_v19 = vmul.f32 -1.442695, %v1127_v39  ;;  %2158 = vpow2.f32 %v1903_v18  ;;  %v1131_v59 = vadd.f32 %v2834_v40, %v2830_v58 }
 0x22c   : > { %v2838_v56 = vpop.f32.mrf.mxu0  ;;  %v2147_v42 = vpop.eup %2146  ;;  %v1906_v49 = vmul.f32 -1.442695, %v1252_v63  ;;  %v1256_v61 = vadd.f32 %v2836_v0, %v2830_v58 }
 0x22d   : > { %v2840_v50 = vpop.f32.mrf.mxu1  ;;  %2160 = vpow2.f32 %v1904_v19  ;;  %v1410_v52 = vadd.f32 1.0, %v2147_v42  ;;  %v1133_v8 = vadd.f32 %v2838_v56, %v2830_v58  ;;  %v1907_v29 = vmul.f32 -1.442695, %v1131_v59 }
 0x22e   : > { %v2842_v11 = vpop.f32.mrf.mxu0  ;;  %2162 = vpow2.f32 %v1893_v27  ;;  %v2149_v45 = vpop.eup %2148  ;;  %v1258_v32 = vadd.f32 %v2840_v50, %v2830_v58  ;;  %v1909_v0 = vmul.f32 -1.442695, %v1256_v61 }
 0x22f   : > { %v2844_v15 = vpop.f32.mrf.mxu1  ;;  %2164 = vpow2.f32 %v1894_v9  ;;  %v1411_v54 = vadd.f32 1.0, %v2149_v45  ;;  %v1137_v40 = vadd.f32 %v2842_v11, %v2832_v13  ;;  %v1908_v19 = vmul.f32 -1.442695, %v1133_v8 }
 0x230   : > { %v2846_v23 = vpop.f32.mrf.mxu0  ;;  %2166 = vpow2.f32 %v1897_v28  ;;  %v2151_v16 = vpop.eup %2150  ;;  %v1262_v14 = vadd.f32 %v2844_v15, %v2832_v13  ;;  %v1910_v11 = vmul.f32 -1.442695, %v1258_v32 }
 0x231   : > { %v2848_v26 = vpop.f32.mrf.mxu1  ;;  %2168 = vpow2.f32 %v1898_v33  ;;  %v1414_v57 = vadd.f32 1.0, %v2151_v16  ;;  %v1139_v58 = vadd.f32 %v2846_v23, %v2832_v13  ;;  %v1911_v31 = vmul.f32 -1.442695, %v1137_v40 }
 0x232   : > { %v2850_v2 = vpop.f32.mrf.mxu0  ;;  %v2153_v3 = vpop.eup %2152  ;;  %2170 = vpow2.f32 %v1901_v22  ;;  %v1264_v20 = vadd.f32 %v2848_v26, %v2832_v13  ;;  %v1913_v12 = vmul.f32 -1.442695, %v1262_v14 }
 0x233   : > { %v2852_v21 = vpop.f32.mrf.mxu1  ;;  %2172 = vpow2.f32 %v1902_v4  ;;  %v1415_v44 = vadd.f32 1.0, %v2153_v3  ;;  %v1143_v15 = vadd.f32 %v2850_v2, %v2826_v37  ;;  %v1912_v13 = vmul.f32 -1.442695, %v1139_v58 }
 0x234   : > { %v2854_v24 = vpop.f32.mrf.mxu0  ;;  %v2155_v60 = vpop.eup %2154  ;;  %2174 = vpow2.f32 %v1905_v48  ;;  %v1914_v30 = vmul.f32 -1.442695, %v1264_v20  ;;  %v1268_v58 = vadd.f32 %v2852_v21, %v2826_v37 }
 0x235   : > { %v2856_v38 = vpop.f32.mrf.mxu1  ;;  %2176 = vpow2.f32 %v1906_v49  ;;  %v1418_v1 = vadd.f32 1.0, %v2155_v60  ;;  %v1145_v23 = vadd.f32 %v2854_v24, %v2826_v37  ;;  %v1915_v63 = vmul.f32 -1.442695, %v1143_v15 }
 0x236   : > { %v1148_v53 = vpop.f32.mrf.mxu0  ;;  %v2157_v46 = vpop.eup %2156  ;;  %2178 = vrcp.f32 %v1410_v52  ;;  %v1270_v14 = vadd.f32 %v2856_v38, %v2826_v37 }
 0x237   : > { %v2858_v7 = vpop.f32.mrf.mxu1  ;;  %2180 = vrcp.f32 %v1411_v54  ;;  %v1419_v5 = vadd.f32 1.0, %v2157_v46  ;;  %v1149_v26 = vadd.f32 %v1148_v53, %v2828_v43  ;;  %v1916_v4 = vmul.f32 -1.442695, %v1145_v23 }
 0x238   : > { %v2159_v51 = vpop.eup %2158  ;;  %v1150_v41 = vpop.f32.mrf.mxu0  ;;  %2182 = vrcp.f32 %v1414_v57  ;;  %v1274_v40 = vadd.f32 %v2858_v7, %v2828_v43  ;;  %v1918_v15 = vmul.f32 -1.442695, %v1270_v14 }
 0x239   : > { %v1275_v6 = vpop.f32.mrf.mxu1  ;;  %v1422_v55 = vadd.f32 1.0, %v2159_v51  ;;  %2184 = vrcp.f32 %v1415_v44  ;;  %v1151_v2 = vadd.f32 %v1150_v41, %v2828_v43  ;;  %v1919_v49 = vmul.f32 -1.442695, %v1149_v26 }
 0x23a   : > { %v2161_v62 = vpop.eup %2160  ;;  %2186 = vrcp.f32 %v1418_v1  ;;  %v1154_v39 = vpop.f32.mrf.mxu0  ;;  %v1276_v22 = vadd.f32 %v1275_v6, %v2828_v43  ;;  %v1921_v7 = vmul.f32 -1.442695, %v1274_v40 }
 0x23b   : > { %v1423_v47 = vadd.f32 1.0, %v2161_v62  ;;  %v2870_v10 = vpop.eup %2162  ;;  %2188 = vrcp.f32 %v1419_v5  ;;  %v1279_v18 = vpop.f32.mrf.mxu1  ;;  %v1155_v45 = vadd.f32 %v1154_v39, %v2822_v35  ;;  %v1920_v53 = vmul.f32 -1.442695, %v1151_v2 }
 0x23c   : > { %v2874_v56 = vpop.eup %2164  ;;  %2190 = vrcp.f32 %v1422_v55  ;;  %v1156_v34 = vpop.f32.mrf.mxu0  ;;  %v1280_v3 = vadd.f32 %v1279_v18, %v2822_v35  ;;  %v1922_v46 = vmul.f32 -1.442695, %v1276_v22 }
 0x23d   : > { %v2878_v50 = vpop.eup %2166  ;;  %2192 = vrcp.f32 %v1423_v47  ;;  %v1281_v9 = vpop.f32.mrf.mxu1  ;;  %v1157_v60 = vadd.f32 %v1156_v34, %v2822_v35  ;;  %v1923_v62 = vmul.f32 -1.442695, %v1155_v45  ;;  %v1917_v34 = vmul.f32 -1.442695, %v1268_v58 }
 0x23e   : > { %v2882_v25 = vpop.eup %2168  ;;  %2194 = vpow2.f32 %v1907_v29  ;;  %v1160_v24 = vpop.f32.mrf.mxu0  ;;  %v1282_v57 = vadd.f32 %v1281_v9, %v2822_v35  ;;  %v1925_v5 = vmul.f32 -1.442695, %v1280_v3 }
 0x23f   : > { %v2886_v27 = vpop.eup %2170  ;;  %2196 = vpow2.f32 %v1909_v0  ;;  %v1285_v48 = vpop.f32.mrf.mxu1  ;;  %v1161_v1 = vadd.f32 %v1160_v24, %v2824_v36  ;;  %v1924_v55 = vmul.f32 -1.442695, %v1157_v60 }
 0x240   : > { %v2890_v17 = vpop.eup %2172  ;;  %2198 = vpow2.f32 %v1908_v19  ;;  %v1162_v51 = vpop.f32.mrf.mxu0  ;;  %v1286_v61 = vadd.f32 %v1285_v48, %v2824_v36  ;;  %v1926_v47 = vmul.f32 -1.442695, %v1282_v57 }
 0x241   : > { %v2893_v28 = vpop.eup %2174  ;;  %2200 = vpow2.f32 %v1910_v11  ;;  %v1287_v59 = vpop.f32.mrf.mxu1  ;;  %v1163_v35 = vadd.f32 %v1162_v51, %v2824_v36  ;;  %v1927_v39 = vmul.f32 -1.442695, %v1161_v1 }
 0x242   : > { %v2896_v33 = vpop.eup %2176  ;;  %2202 = vpow2.f32 %v1911_v31  ;;  %v1288_v32 = vadd.f32 %v1287_v59, %v2824_v36  ;;  %v1929_v18 = vmul.f32 -1.442695, %v1286_v61 }
 0x243   : > { %v2899_v42 = vpop.eup %2178  ;;  %2204 = vpow2.f32 %v1913_v12  ;;  %v1928_v11 = vmul.f32 -1.442695, %v1163_v35 }
 0x244   : > { %v2902_v16 = vpop.eup %2180  ;;  %2206 = vpow2.f32 %v1912_v13  ;;  %v1930_v20 = vmul.f32 -1.442695, %v1288_v32 }
 0x245   : > { %v2905_v52 = vpop.eup %2182  ;;  %2208 = vpow2.f32 %v1914_v30 }
 0x246   : > { %v2908_v54 = vpop.eup %2184  ;;  %2210 = vpow2.f32 %v1915_v63 }
 0x247   : > { %v2911_v44 = vpop.eup %2186  ;;  %2212 = vpow2.f32 %v1916_v4 }
 0x248   : > { %v2914_v41 = vpop.eup %2188  ;;  %2214 = vpow2.f32 %v1919_v49 }
 0x249   : > { %v2917_v6 = vpop.eup %2190  ;;  %2216 = vpow2.f32 %v1920_v53 }
 0x24a   : > { %v2920_v8 = vpop.eup %2192  ;;  %2218 = vpow2.f32 %v1922_v46 }
 0x24b   : > { %v2195_v29 = vpop.eup %2194  ;;  %2220 = vpow2.f32 %v1923_v62 }
 0x24c   : > { %v2925_v0 = vpop.eup %2196  ;;  %2222 = vpow2.f32 %v1925_v5  ;;  %v1426_v23 = vadd.f32 1.0, %v2195_v29 }
 0x24d   : > { %v2199_v19 = vpop.eup %2198  ;;  %2224 = vpow2.f32 %v1924_v55 }
 0x24e   : > { %v2931_v36 = vpop.eup %2200  ;;  %2226 = vpow2.f32 %v1926_v47  ;;  %v1427_v21 = vadd.f32 1.0, %v2199_v19 }
 0x24f   : > { %v2203_v43 = vpop.eup %2202  ;;  %2228 = vpow2.f32 %v1927_v39 }
 0x250   : > { %v2933_v31 = vpop.eup %2204  ;;  %2230 = vpow2.f32 %v1929_v18  ;;  %v1430_v13 = vadd.f32 1.0, %v2203_v43 }
 0x251   : > { %v2207_v38 = vpop.eup %2206  ;;  %2232 = vpow2.f32 %v1928_v11 }
 0x252   : > { %v2209_v12 = vpop.eup %2208  ;;  %2234 = vpow2.f32 %v1930_v20  ;;  %v1431_v30 = vadd.f32 1.0, %v2207_v38  ;;  %v1432_v38 = vadd.f32 1.0, %v2933_v31  ;;  %v1421_v31 = vadd.f32 1.0, %v2890_v17 }
 0x253   : > { %v2211_v37 = vpop.eup %2210  ;;  %2236 = vpow2.f32 %v1921_v7  ;;  %v1433_v7 = vadd.f32 1.0, %v2209_v12  ;;  %v1424_v12 = vadd.f32 1.0, %v2893_v28  ;;  %v1413_v28 = vadd.f32 1.0, %v2874_v56 }
 0x254   : > { %v2213_v9 = vpop.eup %2212  ;;  %2238 = vpow2.f32 %v1918_v15  ;;  %v1434_v63 = vadd.f32 1.0, %v2211_v37 }
 0x255   : > { %v2215_v26 = vpop.eup %2214  ;;  %2240 = vpow2.f32 %v1917_v34  ;;  %v1435_v24 = vadd.f32 1.0, %v2213_v9 }
 0x256   : > { %v2217_v2 = vpop.eup %2216  ;;  %2242 = vrcp.f32 %v1426_v23  ;;  %v1438_v45 = vadd.f32 1.0, %v2215_v26  ;;  %v1429_v23 = vadd.f32 1.0, %v2931_v36  ;;  %v1420_v36 = vadd.f32 1.0, %v2886_v27 }
 0x257   : > { %v2219_v22 = vpop.eup %2218  ;;  %2244 = vrcp.f32 %v1427_v21  ;;  %v1439_v49 = vadd.f32 1.0, %v2217_v2  ;;  %v1428_v21 = vadd.f32 1.0, %v2925_v0  ;;  %v1417_v0 = vadd.f32 1.0, %v2882_v25 }
 0x258   : > { %v2221_v4 = vpop.eup %2220  ;;  %2246 = vrcp.f32 %v1430_v13  ;;  %v1441_v39 = vadd.f32 1.0, %v2219_v22  ;;  %v1425_v13 = vadd.f32 1.0, %v2896_v33  ;;  %v1416_v33 = vadd.f32 1.0, %v2878_v50 }
 0x259   : > { %v2223_v48 = vpop.eup %2222  ;;  %2248 = vrcp.f32 %v1431_v30  ;;  %v1442_v53 = vadd.f32 1.0, %v2221_v4  ;;  %v1412_v4 = vadd.f32 1.0, %v2870_v10 }
 0x25a   : > { %v2225_v3 = vpop.eup %2224  ;;  %2250 = vrcp.f32 %v1434_v63  ;;  %v1444_v29 = vadd.f32 1.0, %v2223_v48 }
 0x25b   : > { %v2227_v60 = vpop.eup %2226  ;;  %2252 = vrcp.f32 %v1435_v24  ;;  %v1443_v46 = vadd.f32 1.0, %v2225_v3 }
 0x25c   : > { %v2229_v57 = vpop.eup %2228  ;;  %2254 = vrcp.f32 %v1438_v45  ;;  %v1445_v35 = vadd.f32 1.0, %v2227_v60 }
 0x25d   : > { %v2231_v51 = vpop.eup %2230  ;;  %2256 = vrcp.f32 %v1439_v49  ;;  %v1446_v62 = vadd.f32 1.0, %v2229_v57 }
 0x25e   : > { %v2233_v1 = vpop.eup %2232  ;;  %2258 = vrcp.f32 %v1442_v53  ;;  %v1448_v5 = vadd.f32 1.0, %v2231_v51 }
 0x25f   : > { %v2235_v59 = vpop.eup %2234  ;;  %2260 = vrcp.f32 %v1443_v46  ;;  %v1447_v61 = vadd.f32 1.0, %v2233_v1 }
 0x260   : > { %v2237_v55 = vpop.eup %2236  ;;  %2262 = vrcp.f32 %v1446_v62  ;;  %v1449_v47 = vadd.f32 1.0, %v2235_v59 }
 0x261   : > { %v2239_v32 = vpop.eup %2238  ;;  %2264 = vrcp.f32 %v1447_v61  ;;  %v1440_v18 = vadd.f32 1.0, %v2237_v55 }
 0x262   : > { %v2241_v40 = vpop.eup %2240  ;;  %2266 = vrcp.f32 %v1449_v47  ;;  %v1437_v58 = vadd.f32 1.0, %v2239_v32 }
 0x263   : > { %v2935_v14 = vpop.eup %2242  ;;  %2268 = vrcp.f32 %v1448_v5  ;;  %v1436_v20 = vadd.f32 1.0, %v2241_v40  ;;  %v1535_v5 = vpop.permute.xlu0 %1534 }
 0x264   : > { %v2937_v19 = vpop.eup %2244  ;;  %2270 = vrcp.f32 %v1445_v35 }
 0x265   : > { %v2939_v11 = vpop.eup %2246  ;;  %2272 = vrcp.f32 %v1444_v29 }
 0x266   : > { %v2249_v43 = vpop.eup %2248  ;;  %2274 = vrcp.f32 %v1441_v39 }
 0x267   : > { %v2251_v15 = vpop.eup %2250  ;;  %2276 = vrcp.f32 %v1440_v18 }
 0x268   : > { %v2253_v34 = vpop.eup %2252  ;;  %2278 = vrcp.f32 %v1437_v58 }
 0x269   : > { %v2255_v37 = vpop.eup %2254  ;;  %2280 = vrcp.f32 %v1436_v20 }
 0x26a   : > { %v2257_v9 = vpop.eup %2256  ;;  %2282 = vrcp.f32 %v1433_v7 }
 0x26b   : > { %v2259_v26 = vpop.eup %2258  ;;  %2284 = vrcp.f32 %v1432_v38 }
 0x26c   : > { %v2261_v30 = vpop.eup %2260  ;;  %2286 = vrcp.f32 %v1429_v23 }
 0x26d   : > { %v2263_v2 = vpop.eup %2262  ;;  %2288 = vrcp.f32 %v1428_v21 }
 0x26e   : > { %v2265_v63 = vpop.eup %2264  ;;  %2290 = vrcp.f32 %v1425_v13 }
 0x26f   : > { %v2267_v22 = vpop.eup %2266  ;;  %2292 = vrcp.f32 %v1424_v12  ;;  %1556 = vmatprep.subr.mxu0 %v2265_v63 }
 0x270   : > { %v2269_v24 = vpop.eup %2268  ;;  %2294 = vrcp.f32 %v1421_v31  ;;  %1627 = vmatprep.subr.mxu1 %v2267_v22  ;;  %1557 = vmatpush1.msra.mxu0 %v2263_v2 }
 0x271   : > { %v2271_v17 = vpop.eup %2270  ;;  %2296 = vrcp.f32 %v1420_v36  ;;  %1628 = vmatpush1.msra.mxu1 %v2269_v24  ;;  %1558 = vmatprep.subr.mxu0 %v2261_v30 }
 0x272   : > { %v2273_v27 = vpop.eup %2272  ;;  %2298 = vrcp.f32 %v1417_v0  ;;  %1629 = vmatprep.subr.mxu1 %v2271_v17  ;;  %1559 = vmatpush1.msra.mxu0 %v2259_v26 }
 0x273   : > { %v2275_v25 = vpop.eup %2274  ;;  %2300 = vrcp.f32 %v1416_v33  ;;  %1630 = vmatpush1.msra.mxu1 %v2273_v27  ;;  %1560 = vmatprep.subr.mxu0 %v2257_v9 }
 0x274   : > { %v2277_v50 = vpop.eup %2276  ;;  %2302 = vrcp.f32 %v1413_v28  ;;  %1631 = vmatprep.subr.mxu1 %v2275_v25  ;;  %1561 = vmatpush1.msra.mxu0 %v2255_v37 }
 0x275   : > { %v2279_v56 = vpop.eup %2278  ;;  %2304 = vrcp.f32 %v1412_v4  ;;  %1632 = vmatpush1.msra.mxu1 %v2277_v50  ;;  %1562 = vmatprep.subr.mxu0 %v2253_v34 }
 0x276   : > { %v2281_v10 = vpop.eup %2280  ;;  %1633 = vmatprep.subr.mxu1 %v2279_v56  ;;  %1563 = vmatpush1.msra.mxu0 %v2251_v15 }
 0x277   : > { %v2283_v45 = vpop.eup %2282  ;;  %1634 = vmatpush1.msra.mxu1 %v2281_v10  ;;  %1564 = vmatprep.subr.mxu0 %v2249_v43 }
 0x278   : > { %v2285_v48 = vpop.eup %2284  ;;  %1635 = vmatprep.subr.mxu1 %v2283_v45  ;;  %1565 = vmatpush1.msra.mxu0 %v2939_v11 }
 0x279   : > { %v2287_v49 = vpop.eup %2286  ;;  %1636 = vmatpush1.msra.mxu1 %v2285_v48  ;;  %1566 = vmatprep.subr.mxu0 %v2937_v19 }
 0x27a   : > { %v2289_v3 = vpop.eup %2288  ;;  %1637 = vmatprep.subr.mxu1 %v2287_v49  ;;  %1567 = vmatpush1.msra.mxu0 %v2935_v14 }
 0x27b   : > { %v2291_v53 = vpop.eup %2290  ;;  %1638 = vmatpush1.msra.mxu1 %v2289_v3  ;;  %1568 = vmatprep.subr.mxu0 %v2920_v8 }
 0x27c   : > { %v2293_v60 = vpop.eup %2292  ;;  %1639 = vmatprep.subr.mxu1 %v2291_v53  ;;  %1569 = vmatpush1.msra.mxu0 %v2917_v6  ;;  %v1530_v6 = vld [vmem:[%s3010_s5] sm:$0x1] }
 0x27d   : > { %v2295_v46 = vpop.eup %2294  ;;  %1640 = vmatpush1.msra.mxu1 %v2293_v60  ;;  %1570 = vmatprep.subr.mxu0 %v2914_v41 }
 0x27e   : > { %v2297_v57 = vpop.eup %2296  ;;  %1641 = vmatprep.subr.mxu1 %v2295_v46  ;;  %1571 = vmatpush1.msra.mxu0 %v2911_v44  ;;  %v2370_v44 = vmov 1966171168  }
 0x27f   : > { %v2299_v51 = vpop.eup %2298  ;;  %1642 = vmatpush1.msra.mxu1 %v2297_v57  ;;  %1572 = vmatprep.subr.mxu0 %v2908_v54  ;;  %v1537_v54 = vlaneseq  ;;  %v1693_v1 = vunpack.c.l.s4 %v2370_v44 }
 0x280   : > { %v2301_v62 = vpop.eup %2300  ;;  %1643 = vmatprep.subr.mxu1 %v2299_v51  ;;  %1573 = vmatpush1.msra.mxu0 %v2905_v52 }
 0x281   : > { %v2303_v8 = vpop.eup %2302  ;;  %1644 = vmatpush1.msra.mxu1 %v2301_v62  ;;  %1574 = vmatprep.subr.mxu0 %v2902_v16  ;;  %v1538_v52 = vshrl.u32 %v1537_v54, 7  ;;  %v1694_v61 = vunpack.c.0.s8 %v1693_v1  ;;  %vm1717_vm3 = vcmp.lt.s32.totalorder %v1537_v54, 512 }
 0x282   : > { %v2305_v41 = vpop.eup %2304  ;;  %1645 = vmatprep.subr.mxu1 %v2303_v8  ;;  %1575 = vmatpush1.msra.mxu0 %v2899_v42 }
 0x283   : > { %1646 = vmatpush1.msra.mxu1 %v2305_v41  ;;  %1931 = vmatmul.mubr.msk.f32.vlgmr.msra.gmra.mxu0 %vm1009_vm2, %v1530_v6  ;;  %v1539_v59 = vsub.s32 0, %v1538_v52  ;;  %v1697_v32 = vsub.s32 %v1694_v61, %v1538_v52 }
 0x284   : > { %1932 = vmatmul.mubr.msk.f32.vlgmr.msra.gmra.mxu1 %vm1009_vm2, %v1530_v6 }
 0x285   : > { %v1540_v16 = vrot.slane %v1535_v5, %v1539_v59 }
 0x343   : > { %v1610_v55 = vpop.f32.mrf.mxu0 }
 0x344   : > { %v1681_v35 = vpop.f32.mrf.mxu1  ;;  %v1611_v42 = vadd.f32 %v1610_v55, %v1540_v16 }
 0x345   : > { %v1612_v47 = vpop.f32.mrf.mxu0  ;;  %v1682_v39 = vadd.f32 %v1681_v35, %v1540_v16 }
 0x346   : > { %v1613_v29 = vadd.f32 %v1612_v47, %v1540_v16  ;;  %v1683_v40 = vpop.f32.mrf.mxu1 }
 0x347   : > { %v1684_v14 = vadd.f32 %v1683_v40, %v1540_v16 }
 0x348   : > { %v1690_v18 = vcombine.low %v1611_v42, %v1613_v29 }
 0x349   : > { %v1691_v19 = vcombine.low %v1682_v39, %v1684_v14 }
 0x34a   : > { %v1698_v58 = vrot.slane %v1690_v18, %v1697_v32 }
 0x34b   : > { %v1705_v11 = vrot.slane %v1691_v19, %v1697_v32 }
 0x34d   : > { %v1706_v20 = vcombine.low %v1698_v58, %v1705_v11 }
 0x34f   : > { %v1713_v43 = vrot.slane %v1706_v20, %v1697_v32 }
 0x351   : > { %1719 = vst.msk [vmem:[%s320_s24] sm:$0xf] %vm1717_vm3, %v1713_v43 }
 0x352   : > { %2319 = shalt.err (!%p2316_p5)
}
 0x353   : > { %s2320_s18 = scalar_lea.hbm %s1733_s10, 64  ;;  %s2324_s20 = scalar_lea.hbm %s3012_s7, 128 }
 0x354   : > { %p2321_p7 = scmp.ne.s32.totalorder %s1733_s10, %s2320_s18  ;;  %p2325_p12 = scmp.lt.s32.totalorder %s1733_s10, %s3012_s7 }
 0x355   : > { %p2326_p13 = scmp.lt.s32.totalorder %s2324_s20, %s2320_s18 }
 0x356   : > { %p2322_p10 = pnand %p2321_p7, %p2453_p6 }
 0x357   : > { %p2327_p0 = por %p2326_p13, %p2325_p12 }
 0x358   : > { %p2323_p11 = pneg %p2322_p10 }
 0x35a   : > { %p2328_p9 = pnand %p2327_p0, %p2323_p11 }
 0x35c   : > { %2331 = shalt.err (!%p2328_p9)
}
 0x35d   : > { %1942 = dma.vmem_to_hbm [thread:$0]  (%p2453_p6), %s1736_s25, 64, %s1733_s10, %s1721_s14  }
 0x35e PF: > { %s1747_s24 = sand.u32 1, %s2354_s26   ;;  %p3016_p1 = scmp.ge.s32.totalorder %s2366_s29, 2 }
 0x35f   : > { %s1748_s30 = scalar_lea.sflag [#allocation5], %s1747_s24 }
 0x360   : > { %p1945_p2 = pnand %p3016_p1, %p2457_p8 }
 0x362   : > { %p1946_p3 = pneg %p1945_p2 }
 0x364   : > { %2349 = dma.done.wait (%p1946_p3), %s1748_s30, 64  }
 0x365   : > { %2351 = vsyncadd (%p1946_p3), %s1748_s30, 4294967232  ;;  %p19_p9 = scmp.ge.s32.totalorder %s2438_s8, 4   ;;  %s3017_s26 = smov %s2358_s27 }
 0x366   : > { %s3018_s27 = smov %s2362_s28  ;;  %s3019_s28 = smov %s2451_s11 }
 0x367   : > { %s3020_s29 = smov %s2438_s8  ;;  %21 = sbr.rel (!%p19_p9) target bundleno = 6 (0x6), region = 111 }
 0x36c   :  { %1753 = vsyncpa [#allocation5], 1 }
 0x36d   :  { %1755 = vsyncpa [#allocation5 + $0x1], 1 }

</bundles_post_ra>
